<compile_context>
chip_gen: v7x
topology: tpu7x:2x2x1
jax: 0.10.0
libtpu: 0.0.40
codegen_flags: <defaults>
</compile_context>

<pallas_src>
import functools

import jax
import jax.numpy as jnp
from jax import lax
from jax.experimental import pallas as pl
from jax.experimental.pallas import tpu as pltpu


# ----------------------------------------------------------------------------
# Pallas kernel: one grid step == one batch element, fused in VMEM.
# ----------------------------------------------------------------------------
def htm_kernel(chunk,
               x_ref, wproj_ref, wc0_ref, wc1_ref, wc2_ref, bc_ref,
               wzbc_ref, bdt_ref, a_ref, dpar_ref, wagg_ref,
               out_ref,
               delta_scr, u_scr, b_scr, c_scr, y_scr,
               da_scr, dbu_scr, hh_scr):
    f32 = jnp.float32
    bf16 = jnp.bfloat16

    x = x_ref[0]                                                        # (L, Din) bf16
    L = x.shape[0]

    # ---- x_proj (weights pre-transposed to (Din, H), bf16) -------------------
    xp = jnp.dot(x, wproj_ref[...], preferred_element_type=f32)         # (L, H) f32
    H = xp.shape[1]

    # ---- conv1d: channels = seq rows, length = feature axis, k=3, pad=1 ------
    # shifted views via XLU roll + edge mask; three accumulating MXU dots
    # (no (3L,H) concat intermediate).
    col = lax.broadcasted_iota(jnp.int32, xp.shape, 1)
    x_prev = jnp.where(col == 0, 0.0, pltpu.roll(xp, shift=1, axis=1))       # x_pad[:, j-1]
    x_next = jnp.where(col == H - 1, 0.0, pltpu.roll(xp, shift=H - 1, axis=1))  # x_pad[:, j+1]
    u = (jnp.dot(wc1_ref[...], xp.astype(bf16), preferred_element_type=f32)
         + jnp.dot(wc0_ref[...], x_prev.astype(bf16), preferred_element_type=f32)
         + jnp.dot(wc2_ref[...], x_next.astype(bf16), preferred_element_type=f32)
         + bc_ref[...])                                                 # (L, H) f32

    # ---- fused SSM projections: one (L,H)x(H,Di+2N) dot for z / B / C --------
    N, Di = a_ref.shape
    u_bf = u.astype(bf16)
    zbc = jnp.dot(u_bf, wzbc_ref[...], preferred_element_type=f32)      # (L, Di+2N) f32
    z = zbc[:, :Di] + bdt_ref[...]                                      # (L, Di)
    delta = jnp.maximum(z, 0.0) + jnp.log(1.0 + jnp.exp(-jnp.abs(z)))   # softplus (f32)

    delta_scr[...] = delta
    u_scr[...] = u
    b_scr[...] = zbc[:, Di:Di + N]
    c_scr[...] = zbc[:, Di + N:Di + 2 * N]

    # ---- chunked selective scan; state h is (N, Di): Di on the lane axis -----
    a3 = a_ref[...][None, :, :]                     # (1, N, Di), hoisted out of the loop
    n_chunks = L // chunk
    inner_unroll = min(8, chunk)

    def chunk_body(ci, h):
        l0 = pl.multiple_of(ci * chunk, chunk)
        d_c = delta_scr[pl.ds(l0, chunk), :]        # (C, Di)
        u_c = u_scr[pl.ds(l0, chunk), :]            # (C, Di)
        b_c = b_scr[pl.ds(l0, chunk), :]            # (C, N)
        c_c = c_scr[pl.ds(l0, chunk), :]            # (C, N)

        da_scr[...] = jnp.exp(d_c[:, None, :] * a3)                # (C, N, Di)
        dbu_scr[...] = (d_c * u_c)[:, None, :] * b_c[:, :, None]   # (C, N, Di)

        # serial recurrence: only mul+add on the carry chain + unmasked (N,Di) store
        def step(c, h):
            h = da_scr[c] * h + dbu_scr[c]          # (N, Di)
            hh_scr[c] = h
            return h

        h = lax.fori_loop(0, chunk, step, h, unroll=inner_unroll)

        # y for the whole chunk, vectorized outside the serial loop
        y_scr[pl.ds(l0, chunk), :] = jnp.sum(hh_scr[...] * c_c[:, :, None], axis=1)
        return h

    lax.fori_loop(0, n_chunks, chunk_body, jnp.zeros((N, Di), f32))

    # ---- y + D*u, then x_aggregate (single scan; mean over identical scans) ---
    y = y_scr[...] + dpar_ref[...] * u_scr[...]                         # (L, Di) f32
    out = jnp.dot(y.astype(bf16), wagg_ref[...], preferred_element_type=f32)   # (L, Dout)
    out_ref[0] = out.astype(out_ref.dtype)


# ----------------------------------------------------------------------------
# Helpers
# ----------------------------------------------------------------------------
def _vmem_capacity_bytes():
    try:
        info = pltpu.get_tpu_info()
        cap = getattr(info, "vmem_capacity_bytes", None)
        if cap:
            return int(cap)
    except Exception:
        pass
    return 64 * 2 ** 20     # conservative fallback (v7x per-core VMEM)


def _pick_chunk(L):
    if L <= 256:
        return L
    for c in range(256, 7, -1):     # largest divisor of L in [8, 256]
        if L % c == 0:
            return c
    # TODO(synk): pad L host-side for long L with no divisor in [8, 256]
    return L


# ----------------------------------------------------------------------------
# Wrapper
# ----------------------------------------------------------------------------
def htm_forward(x, params, num_scans, chunk=None):
    (W_proj, Wc0, Wc1, Wc2, bc, W_dbc, W_dt, b_dt, A_log, D_par, W_agg) = params
    B, L, Din = x.shape
    Di, R = W_dt.shape
    N = A_log.shape[1]
    H = W_proj.shape[0]
    Dout = W_agg.shape[0]
    assert H == Di, "hidden dim feeding the SSM must equal dim_inner"
    del num_scans  # mean over num_scans identical deterministic scans == a single scan

    f32, bf16 = jnp.float32, jnp.bfloat16

    # --- host-side weight packing (done once, outside the per-batch grid loop) --
    Wp_t = W_proj.T.astype(bf16)                                    # (Din, H)
    Wc0_b, Wc1_b, Wc2_b = Wc0.astype(bf16), Wc1.astype(bf16), Wc2.astype(bf16)  # (L, L)
    W_delta, W_B, W_C = W_dbc[:R], W_dbc[R:R + N], W_dbc[R + N:R + 2 * N]
    Wz_t = W_delta.T @ W_dt.T                                       # (H, Di) dt fold, f32
    Wzbc_t = jnp.concatenate([Wz_t, W_B.T, W_C.T], axis=1).astype(bf16)  # (H, Di+2N) fused
    A_t = (-jnp.exp(A_log)).T.astype(f32)                           # (N, Di)
    Wagg_t = W_agg.T.astype(bf16)                                   # (Di, Dout)
    bc_f = bc.astype(f32)
    bdt_f = b_dt.astype(f32)
    dpar_f = D_par.astype(f32)
    x_bf = x.astype(bf16)

    # --- chunk size for the in-kernel scan --------------------------------------
    if chunk is None:
        chunk = _pick_chunk(L)
    assert L % chunk == 0

    weights = (Wp_t, Wc0_b, Wc1_b, Wc2_b, bc_f, Wzbc_t, bdt_f, A_t, dpar_f, Wagg_t)

    def full(arr):
        return pl.BlockSpec(arr.shape, lambda b, _nd=arr.ndim: (0,) * _nd)

    scratch_shapes = [
        pltpu.VMEM((L, Di), f32),          # delta
        pltpu.VMEM((L, Di), f32),          # u (D*u and delta*u derived from it)
        pltpu.VMEM((L, N), f32),           # B
        pltpu.VMEM((L, N), f32),           # C
        pltpu.VMEM((L, Di), f32),          # y
        pltpu.VMEM((chunk, N, Di), f32),   # exp(delta*A)   (chunk-bounded)
        pltpu.VMEM((chunk, N, Di), f32),   # delta*u*B      (chunk-bounded)
        pltpu.VMEM((chunk, N, Di), f32),   # h history      (chunk-bounded)
    ]

    # --- generation-aware VMEM budget (v7x 64 MiB physical; v5e/v6e 128 MiB) ----
    scratch_bytes = 4 * (3 * L * Di + 2 * L * N + 3 * chunk * N * Di)
    block_bytes = 2 * (L * Din * 2 + L * Dout * 4)      # double-buffered in/out blocks
    weight_bytes = sum(int(w.size) * w.dtype.itemsize for w in weights)
    need = scratch_bytes + block_bytes + 2 * weight_bytes
    cap = _vmem_capacity_bytes()
    vmem_limit = int(min(int(0.85 * cap), max(32 * 2 ** 20, int(1.5 * need))))

    kernel = functools.partial(htm_kernel, chunk)

    return pl.pallas_call(
        kernel,
        out_shape=jax.ShapeDtypeStruct((B, L, Dout), jnp.float32),
        grid_spec=pltpu.PrefetchScalarGridSpec(
            num_scalar_prefetch=0,
            grid=(B,),
            in_specs=[pl.BlockSpec((1, L, Din), lambda b: (b, 0, 0))]
                     + [full(w) for w in weights],
            out_specs=pl.BlockSpec((1, L, Dout), lambda b: (b, 0, 0)),
            scratch_shapes=scratch_shapes,
        ),
        compiler_params=pltpu.CompilerParams(
            dimension_semantics=("parallel",),   # batch elems independent -> 2 TCs on v7x
            vmem_limit_bytes=vmem_limit,
        ),
    )(x_bf, *weights)


# ----------------------------------------------------------------------------
# Pure-JAX reference (same math, all f32) for validation
# ----------------------------------------------------------------------------
def htm_reference(x, params, num_scans):
    (W_proj, Wc0, Wc1, Wc2, bc, W_dbc, W_dt, b_dt, A_log, D_par, W_agg) = params
    B, L, Din = x.shape
    Di, R = W_dt.shape
    N = A_log.shape[1]

    xp = jnp.einsum('bld,hd->blh', x, W_proj)
    H = xp.shape[-1]
    zcol = jnp.zeros((B, L, 1), jnp.float32)
    xr = jnp.concatenate([zcol, xp[:, :, :H - 1]], axis=2)
    xl = jnp.concatenate([xp[:, :, 1:], zcol], axis=2)
    u = (jnp.einsum('oc,bch->boh', Wc0, xr)
         + jnp.einsum('oc,bch->boh', Wc1, xp)
         + jnp.einsum('oc,bch->boh', Wc2, xl)
         + bc[None, :, :])

    dbc = jnp.einsum('blh,kh->blk', u, W_dbc)
    delta_in, Bm, Cm = dbc[..., :R], dbc[..., R:R + N], dbc[..., R + N:R + 2 * N]
    z = jnp.einsum('blr,dr->bld', delta_in, W_dt) + b_dt
    delta = jnp.maximum(z, 0.0) + jnp.log(1.0 + jnp.exp(-jnp.abs(z)))
    A = -jnp.exp(A_log)

    dA = jnp.exp(delta[..., None] * A[None, None])                 # (B, L, Di, N)
    dBu = delta[..., None] * Bm[:, :, None, :] * u[..., None]

    h = jnp.zeros((B, Di, N), jnp.float32)
    ys = []
    for l in range(L):
        h = dA[:, l] * h + dBu[:, l]
        ys.append(jnp.sum(h * Cm[:, l, None, :], axis=-1))
    y = jnp.stack(ys, axis=1) + D_par[None] * u                    # (B, L, Di)

    acc = jnp.zeros_like(y)
    for _ in range(num_scans):
        acc = acc + y
    agg = acc / float(num_scans)

    return jnp.einsum('bld,od->blo', agg, W_agg)


# ----------------------------------------------------------------------------
if __name__ == "__main__":
    # small, lane-aligned, self-consistent shapes
    B, L = 2, 8
    input_dim = 128
    hidden_dim = 128           # == dim_inner for the SSM
    output_dim = 128
    d_state = 16
    dt_rank = 8
    num_scans = 3

    key = jax.random.PRNGKey(0)
    ks = jax.random.split(key, 12)
    s = 0.1

    W_proj = s * jax.random.normal(ks[0], (hidden_dim, input_dim), jnp.float32)
    Wc0 = s * jax.random.normal(ks[1], (L, L), jnp.float32)   # conv weight tap k=0
    Wc1 = s * jax.random.normal(ks[2], (L, L), jnp.float32)   # conv weight tap k=1
    Wc2 = s * jax.random.normal(ks[3], (L, L), jnp.float32)   # conv weight tap k=2
    bc = s * jax.random.normal(ks[4], (L, 1), jnp.float32)    # conv bias (per out channel)
    W_dbc = s * jax.random.normal(ks[5], (dt_rank + 2 * d_state, hidden_dim), jnp.float32)
    W_dt = s * jax.random.normal(ks[6], (hidden_dim, dt_rank), jnp.float32)
    b_dt = s * jax.random.normal(ks[7], (1, hidden_dim), jnp.float32)
    A_log = jnp.log(jnp.tile(jnp.arange(1, d_state + 1, dtype=jnp.float32)[None, :],
                             (hidden_dim, 1)))
    D_par = jnp.ones((1, hidden_dim), jnp.float32)
    W_agg = s * jax.random.normal(ks[8], (output_dim, hidden_dim), jnp.float32)

    params = (W_proj, Wc0, Wc1, Wc2, bc, W_dbc, W_dt, b_dt, A_log, D_par, W_agg)

    x = jax.random.uniform(ks[9], (B, L, input_dim), jnp.float32)

    out = htm_forward(x, params, num_scans)
    out = jax.block_until_ready(out)

    ref = htm_reference(x, params, num_scans)
    assert out.shape == (B, L, output_dim), out.shape
    # Kernel matmuls run with bf16 operands on the MXU (f32 accumulation),
    # reference is pure f32 -> compare with a bf16-appropriate tolerance.
    max_err = float(jnp.max(jnp.abs(out - ref)))
    assert max_err < 5e-2, f"mismatch vs reference: {max_err}"

    print("KERNEL_OK")
</pallas_src>

<mosaic_0001>
module attributes {stable_mosaic.version = 11 : i64} {
  func.func @htm_kernel(%arg0: i32, %arg1: memref<1x8x128xbf16, #tpu.memory_space<vmem>>, %arg2: memref<128x128xbf16, #tpu.memory_space<vmem>>, %arg3: memref<8x8xbf16, #tpu.memory_space<vmem>>, %arg4: memref<8x8xbf16, #tpu.memory_space<vmem>>, %arg5: memref<8x8xbf16, #tpu.memory_space<vmem>>, %arg6: memref<8x1xf32, #tpu.memory_space<vmem>>, %arg7: memref<128x160xbf16, #tpu.memory_space<vmem>>, %arg8: memref<1x128xf32, #tpu.memory_space<vmem>>, %arg9: memref<16x128xf32, #tpu.memory_space<vmem>>, %arg10: memref<1x128xf32, #tpu.memory_space<vmem>>, %arg11: memref<128x128xbf16, #tpu.memory_space<vmem>>, %arg12: memref<1x8x128xf32, #tpu.memory_space<vmem>>, %arg13: memref<8x128xf32, #tpu.memory_space<vmem>>, %arg14: memref<8x128xf32, #tpu.memory_space<vmem>>, %arg15: memref<8x16xf32, #tpu.memory_space<vmem>>, %arg16: memref<8x16xf32, #tpu.memory_space<vmem>>, %arg17: memref<8x128xf32, #tpu.memory_space<vmem>>, %arg18: memref<8x16x128xf32, #tpu.memory_space<vmem>>, %arg19: memref<8x16x128xf32, #tpu.memory_space<vmem>>, %arg20: memref<8x16x128xf32, #tpu.memory_space<vmem>>) attributes {dimension_semantics = [#tpu.dimension_semantics<parallel>], iteration_bounds = array<i64: 2>, scalar_prefetch = 0 : i64, scratch_operands = 8 : i64, tpu.core_type = #tpu.core_type<tc>, window_params = [{transform_indices = @transform_0, window_bounds = array<i64: 1, 8, 128>}, {pipeline_mode = #tpu.pipeline_mode<synchronous>, transform_indices = @transform_1, window_bounds = array<i64: 128, 128>}, {pipeline_mode = #tpu.pipeline_mode<synchronous>, transform_indices = @transform_2, window_bounds = array<i64: 8, 8>}, {pipeline_mode = #tpu.pipeline_mode<synchronous>, transform_indices = @transform_3, window_bounds = array<i64: 8, 8>}, {pipeline_mode = #tpu.pipeline_mode<synchronous>, transform_indices = @transform_4, window_bounds = array<i64: 8, 8>}, {pipeline_mode = #tpu.pipeline_mode<synchronous>, transform_indices = @transform_5, window_bounds = array<i64: 8, 1>}, {pipeline_mode = #tpu.pipeline_mode<synchronous>, transform_indices = @transform_6, window_bounds = array<i64: 128, 160>}, {pipeline_mode = #tpu.pipeline_mode<synchronous>, transform_indices = @transform_7, window_bounds = array<i64: 1, 128>}, {pipeline_mode = #tpu.pipeline_mode<synchronous>, transform_indices = @transform_8, window_bounds = array<i64: 16, 128>}, {pipeline_mode = #tpu.pipeline_mode<synchronous>, transform_indices = @transform_9, window_bounds = array<i64: 1, 128>}, {pipeline_mode = #tpu.pipeline_mode<synchronous>, transform_indices = @transform_10, window_bounds = array<i64: 128, 128>}, {transform_indices = @transform_11, window_bounds = array<i64: 1, 8, 128>}]} {
    %c0 = arith.constant 0 : index
    %c0_0 = arith.constant 0 : index
    %c0_1 = arith.constant 0 : index
    %0 = vector.load %arg1[%c0, %c0_0, %c0_1] : memref<1x8x128xbf16, #tpu.memory_space<vmem>>, vector<1x8x128xbf16>
    %1 = vector.shape_cast %0 : vector<1x8x128xbf16> to vector<8x128xbf16>
    %c0_2 = arith.constant 0 : index
    %c0_3 = arith.constant 0 : index
    %2 = vector.load %arg2[%c0_2, %c0_3] : memref<128x128xbf16, #tpu.memory_space<vmem>>, vector<128x128xbf16>
    %cst = arith.constant dense<0.000000e+00> : vector<8x128xf32>
    %3 = tpu.matmul %1, %2, %cst {dimension_numbers = #tpu.dot_dimension_numbers<[1], [0], [0], [1], [0, 0, 1, 1], [], []>} : vector<8x128xbf16>, vector<128x128xbf16>, vector<8x128xf32> -> vector<8x128xf32>
    %4 = tpu.iota {dimensions = array<i32: 1>} : vector<8x128xi32>
    %c0_i32 = arith.constant 0 : i32
    %5 = vector.broadcast %c0_i32 : i32 to vector<8x128xi32>
    %6 = arith.cmpi eq, %4, %5 : vector<8x128xi32>
    %c1_i32 = arith.constant 1 : i32
    %7 = tpu.dynamic_rotate %3 by %c1_i32 dim 1 : vector<8x128xf32>, i32 -> vector<8x128xf32>
    %cst_4 = arith.constant 0.000000e+00 : f32
    %8 = vector.broadcast %cst_4 : f32 to vector<8x128xf32>
    %9 = arith.select %6, %8, %7 : vector<8x128xi1>, vector<8x128xf32>
    %c127_i32 = arith.constant 127 : i32
    %10 = vector.broadcast %c127_i32 : i32 to vector<8x128xi32>
    %11 = arith.cmpi eq, %4, %10 : vector<8x128xi32>
    %c127_i32_5 = arith.constant 127 : i32
    %12 = tpu.dynamic_rotate %3 by %c127_i32_5 dim 1 : vector<8x128xf32>, i32 -> vector<8x128xf32>
    %cst_6 = arith.constant 0.000000e+00 : f32
    %13 = vector.broadcast %cst_6 : f32 to vector<8x128xf32>
    %14 = arith.select %11, %13, %12 : vector<8x128xi1>, vector<8x128xf32>
    %c0_7 = arith.constant 0 : index
    %c0_8 = arith.constant 0 : index
    %15 = vector.load %arg4[%c0_7, %c0_8] : memref<8x8xbf16, #tpu.memory_space<vmem>>, vector<8x8xbf16>
    %16 = arith.truncf %3 : vector<8x128xf32> to vector<8x128xbf16>
    %cst_9 = arith.constant dense<0.000000e+00> : vector<8x128xf32>
    %17 = tpu.matmul %15, %16, %cst_9 {dimension_numbers = #tpu.dot_dimension_numbers<[1], [0], [0], [1], [0, 0, 1, 1], [], []>} : vector<8x8xbf16>, vector<8x128xbf16>, vector<8x128xf32> -> vector<8x128xf32>
    %c0_10 = arith.constant 0 : index
    %c0_11 = arith.constant 0 : index
    %18 = vector.load %arg3[%c0_10, %c0_11] : memref<8x8xbf16, #tpu.memory_space<vmem>>, vector<8x8xbf16>
    %19 = arith.truncf %9 : vector<8x128xf32> to vector<8x128xbf16>
    %cst_12 = arith.constant dense<0.000000e+00> : vector<8x128xf32>
    %20 = tpu.matmul %18, %19, %cst_12 {dimension_numbers = #tpu.dot_dimension_numbers<[1], [0], [0], [1], [0, 0, 1, 1], [], []>} : vector<8x8xbf16>, vector<8x128xbf16>, vector<8x128xf32> -> vector<8x128xf32>
    %21 = arith.addf %17, %20 : vector<8x128xf32>
    %c0_13 = arith.constant 0 : index
    %c0_14 = arith.constant 0 : index
    %22 = vector.load %arg5[%c0_13, %c0_14] : memref<8x8xbf16, #tpu.memory_space<vmem>>, vector<8x8xbf16>
    %23 = arith.truncf %14 : vector<8x128xf32> to vector<8x128xbf16>
    %cst_15 = arith.constant dense<0.000000e+00> : vector<8x128xf32>
    %24 = tpu.matmul %22, %23, %cst_15 {dimension_numbers = #tpu.dot_dimension_numbers<[1], [0], [0], [1], [0, 0, 1, 1], [], []>} : vector<8x8xbf16>, vector<8x128xbf16>, vector<8x128xf32> -> vector<8x128xf32>
    %25 = arith.addf %21, %24 : vector<8x128xf32>
    %c0_16 = arith.constant 0 : index
    %c0_17 = arith.constant 0 : index
    %26 = vector.load %arg6[%c0_16, %c0_17] : memref<8x1xf32, #tpu.memory_space<vmem>>, vector<8x1xf32>
    %27 = vector.broadcast %26 : vector<8x1xf32> to vector<8x128xf32>
    %28 = arith.addf %25, %27 : vector<8x128xf32>
    %29 = arith.truncf %28 : vector<8x128xf32> to vector<8x128xbf16>
    %c0_18 = arith.constant 0 : index
    %c0_19 = arith.constant 0 : index
    %30 = vector.load %arg7[%c0_18, %c0_19] : memref<128x160xbf16, #tpu.memory_space<vmem>>, vector<128x160xbf16>
    %cst_20 = arith.constant dense<0.000000e+00> : vector<8x160xf32>
    %31 = tpu.matmul %29, %30, %cst_20 {dimension_numbers = #tpu.dot_dimension_numbers<[1], [0], [0], [1], [0, 0, 1, 1], [], []>} : vector<8x128xbf16>, vector<128x160xbf16>, vector<8x160xf32> -> vector<8x160xf32>
    %32 = vector.extract_strided_slice %31 {offsets = [0, 0], sizes = [8, 128], strides = [1, 1]} : vector<8x160xf32> to vector<8x128xf32>
    %c0_21 = arith.constant 0 : index
    %c0_22 = arith.constant 0 : index
    %33 = vector.load %arg8[%c0_21, %c0_22] : memref<1x128xf32, #tpu.memory_space<vmem>>, vector<1x128xf32>
    %34 = vector.broadcast %33 : vector<1x128xf32> to vector<8x128xf32>
    %35 = arith.addf %32, %34 : vector<8x128xf32>
    %cst_23 = arith.constant 0.000000e+00 : f32
    %36 = vector.broadcast %cst_23 : f32 to vector<8x128xf32>
    %37 = arith.maximumf %35, %36 : vector<8x128xf32>
    %38 = math.absf %35 : vector<8x128xf32>
    %cst_24 = arith.constant 0.000000e+00 : f32
    %39 = vector.broadcast %cst_24 : f32 to vector<8x128xf32>
    %40 = arith.subf %39, %38 : vector<8x128xf32>
    %41 = math.exp %40 : vector<8x128xf32>
    %cst_25 = arith.constant 1.000000e+00 : f32
    %42 = vector.broadcast %cst_25 : f32 to vector<8x128xf32>
    %43 = arith.addf %42, %41 : vector<8x128xf32>
    %44 = math.log %43 : vector<8x128xf32>
    %45 = arith.addf %37, %44 : vector<8x128xf32>
    %c0_26 = arith.constant 0 : index
    %c0_27 = arith.constant 0 : index
    %46 = vector.load %arg13[%c0_26, %c0_27] : memref<8x128xf32, #tpu.memory_space<vmem>>, vector<8x128xf32>
    tpu.vector_store %arg13[%c0_26, %c0_27], %45 {strides = array<i32>} : memref<8x128xf32, #tpu.memory_space<vmem>>, vector<8x128xf32>,
    %c0_28 = arith.constant 0 : index
    %c0_29 = arith.constant 0 : index
    %47 = vector.load %arg14[%c0_28, %c0_29] : memref<8x128xf32, #tpu.memory_space<vmem>>, vector<8x128xf32>
    tpu.vector_store %arg14[%c0_28, %c0_29], %28 {strides = array<i32>} : memref<8x128xf32, #tpu.memory_space<vmem>>, vector<8x128xf32>,
    %48 = vector.extract_strided_slice %31 {offsets = [0, 128], sizes = [8, 16], strides = [1, 1]} : vector<8x160xf32> to vector<8x16xf32>
    %c0_30 = arith.constant 0 : index
    %c0_31 = arith.constant 0 : index
    %49 = vector.load %arg15[%c0_30, %c0_31] : memref<8x16xf32, #tpu.memory_space<vmem>>, vector<8x16xf32>
    tpu.vector_store %arg15[%c0_30, %c0_31], %48 {strides = array<i32>} : memref<8x16xf32, #tpu.memory_space<vmem>>, vector<8x16xf32>,
    %50 = vector.extract_strided_slice %31 {offsets = [0, 144], sizes = [8, 16], strides = [1, 1]} : vector<8x160xf32> to vector<8x16xf32>
    %c0_32 = arith.constant 0 : index
    %c0_33 = arith.constant 0 : index
    %51 = vector.load %arg16[%c0_32, %c0_33] : memref<8x16xf32, #tpu.memory_space<vmem>>, vector<8x16xf32>
    tpu.vector_store %arg16[%c0_32, %c0_33], %50 {strides = array<i32>} : memref<8x16xf32, #tpu.memory_space<vmem>>, vector<8x16xf32>,
    %c0_34 = arith.constant 0 : index
    %c0_35 = arith.constant 0 : index
    %52 = vector.load %arg9[%c0_34, %c0_35] : memref<16x128xf32, #tpu.memory_space<vmem>>, vector<16x128xf32>
    %53 = vector.shape_cast %52 : vector<16x128xf32> to vector<1x16x128xf32>
    %cst_36 = arith.constant 0.000000e+00 : f32
    %54 = vector.broadcast %cst_36 : f32 to vector<16x128xf32>
    %c0_i32_37 = arith.constant 0 : i32
    %c8_i32 = arith.constant 8 : i32
    %55 = arith.muli %c0_i32_37, %c8_i32 : i32
    %56 = tpu.assume_multiple %55, 8 : i32
    %57 = arith.index_cast %56 : i32 to index
    %c0_38 = arith.constant 0 : index
    %58 = vector.load %arg13[%57, %c0_38] : memref<8x128xf32, #tpu.memory_space<vmem>>, vector<8x128xf32>
    %59 = arith.index_cast %56 : i32 to index
    %c0_39 = arith.constant 0 : index
    %60 = vector.load %arg14[%59, %c0_39] : memref<8x128xf32, #tpu.memory_space<vmem>>, vector<8x128xf32>
    %61 = arith.index_cast %56 : i32 to index
    %c0_40 = arith.constant 0 : index
    %62 = vector.load %arg15[%61, %c0_40] : memref<8x16xf32, #tpu.memory_space<vmem>>, vector<8x16xf32>
    %63 = arith.index_cast %56 : i32 to index
    %c0_41 = arith.constant 0 : index
    %64 = vector.load %arg16[%63, %c0_41] : memref<8x16xf32, #tpu.memory_space<vmem>>, vector<8x16xf32>
    %65 = vector.shape_cast %58 : vector<8x128xf32> to vector<8x1x128xf32>
    %66 = vector.broadcast %65 : vector<8x1x128xf32> to vector<8x16x128xf32>
    %67 = vector.broadcast %53 : vector<1x16x128xf32> to vector<8x16x128xf32>
    %68 = arith.mulf %66, %67 : vector<8x16x128xf32>
    %69 = math.exp %68 : vector<8x16x128xf32>
    %c0_42 = arith.constant 0 : index
    %c0_43 = arith.constant 0 : index
    %c0_44 = arith.constant 0 : index
    %70 = vector.load %arg18[%c0_42, %c0_43, %c0_44] : memref<8x16x128xf32, #tpu.memory_space<vmem>>, vector<8x16x128xf32>
    tpu.vector_store %arg18[%c0_42, %c0_43, %c0_44], %69 {strides = array<i32>} : memref<8x16x128xf32, #tpu.memory_space<vmem>>, vector<8x16x128xf32>,
    %71 = arith.mulf %58, %60 : vector<8x128xf32>
    %72 = vector.shape_cast %71 : vector<8x128xf32> to vector<8x1x128xf32>
    %73 = vector.shape_cast %62 : vector<8x16xf32> to vector<8x16x1xf32>
    %74 = vector.broadcast %72 : vector<8x1x128xf32> to vector<8x16x128xf32>
    %75 = vector.broadcast %73 : vector<8x16x1xf32> to vector<8x16x128xf32>
    %76 = arith.mulf %74, %75 : vector<8x16x128xf32>
    %c0_45 = arith.constant 0 : index
    %c0_46 = arith.constant 0 : index
    %c0_47 = arith.constant 0 : index
    %77 = vector.load %arg19[%c0_45, %c0_46, %c0_47] : memref<8x16x128xf32, #tpu.memory_space<vmem>>, vector<8x16x128xf32>
    tpu.vector_store %arg19[%c0_45, %c0_46, %c0_47], %76 {strides = array<i32>} : memref<8x16x128xf32, #tpu.memory_space<vmem>>, vector<8x16x128xf32>,
    %c0_i32_48 = arith.constant 0 : i32
    %78 = arith.index_cast %c0_i32_48 : i32 to index
    %c0_49 = arith.constant 0 : index
    %c0_50 = arith.constant 0 : index
    %79 = vector.load %arg18[%78, %c0_49, %c0_50] : memref<8x16x128xf32, #tpu.memory_space<vmem>>, vector<1x16x128xf32>
    %80 = vector.shape_cast %79 : vector<1x16x128xf32> to vector<16x128xf32>
    %81 = arith.mulf %80, %54 : vector<16x128xf32>
    %82 = arith.index_cast %c0_i32_48 : i32 to index
    %c0_51 = arith.constant 0 : index
    %c0_52 = arith.constant 0 : index
    %83 = vector.load %arg19[%82, %c0_51, %c0_52] : memref<8x16x128xf32, #tpu.memory_space<vmem>>, vector<1x16x128xf32>
    %84 = vector.shape_cast %83 : vector<1x16x128xf32> to vector<16x128xf32>
    %85 = arith.addf %81, %84 : vector<16x128xf32>
    %86 = arith.index_cast %c0_i32_48 : i32 to index
    %c0_53 = arith.constant 0 : index
    %c0_54 = arith.constant 0 : index
    %87 = vector.load %arg20[%86, %c0_53, %c0_54] : memref<8x16x128xf32, #tpu.memory_space<vmem>>, vector<1x16x128xf32>
    %88 = vector.shape_cast %87 : vector<1x16x128xf32> to vector<16x128xf32>
    %89 = vector.shape_cast %85 : vector<16x128xf32> to vector<1x16x128xf32>
    tpu.vector_store %arg20[%86, %c0_53, %c0_54], %89 {strides = array<i32>} : memref<8x16x128xf32, #tpu.memory_space<vmem>>, vector<1x16x128xf32>,
    %c1_i32_55 = arith.constant 1 : i32
    %90 = arith.index_cast %c1_i32_55 : i32 to index
    %c0_56 = arith.constant 0 : index
    %c0_57 = arith.constant 0 : index
    %91 = vector.load %arg18[%90, %c0_56, %c0_57] : memref<8x16x128xf32, #tpu.memory_space<vmem>>, vector<1x16x128xf32>
    %92 = vector.shape_cast %91 : vector<1x16x128xf32> to vector<16x128xf32>
    %93 = arith.mulf %92, %85 : vector<16x128xf32>
    %94 = arith.index_cast %c1_i32_55 : i32 to index
    %c0_58 = arith.constant 0 : index
    %c0_59 = arith.constant 0 : index
    %95 = vector.load %arg19[%94, %c0_58, %c0_59] : memref<8x16x128xf32, #tpu.memory_space<vmem>>, vector<1x16x128xf32>
    %96 = vector.shape_cast %95 : vector<1x16x128xf32> to vector<16x128xf32>
    %97 = arith.addf %93, %96 : vector<16x128xf32>
    %98 = arith.index_cast %c1_i32_55 : i32 to index
    %c0_60 = arith.constant 0 : index
    %c0_61 = arith.constant 0 : index
    %99 = vector.load %arg20[%98, %c0_60, %c0_61] : memref<8x16x128xf32, #tpu.memory_space<vmem>>, vector<1x16x128xf32>
    %100 = vector.shape_cast %99 : vector<1x16x128xf32> to vector<16x128xf32>
    %101 = vector.shape_cast %97 : vector<16x128xf32> to vector<1x16x128xf32>
    tpu.vector_store %arg20[%98, %c0_60, %c0_61], %101 {strides = array<i32>} : memref<8x16x128xf32, #tpu.memory_space<vmem>>, vector<1x16x128xf32>,
    %c2_i32 = arith.constant 2 : i32
    %102 = arith.index_cast %c2_i32 : i32 to index
    %c0_62 = arith.constant 0 : index
    %c0_63 = arith.constant 0 : index
    %103 = vector.load %arg18[%102, %c0_62, %c0_63] : memref<8x16x128xf32, #tpu.memory_space<vmem>>, vector<1x16x128xf32>
    %104 = vector.shape_cast %103 : vector<1x16x128xf32> to vector<16x128xf32>
    %105 = arith.mulf %104, %97 : vector<16x128xf32>
    %106 = arith.index_cast %c2_i32 : i32 to index
    %c0_64 = arith.constant 0 : index
    %c0_65 = arith.constant 0 : index
    %107 = vector.load %arg19[%106, %c0_64, %c0_65] : memref<8x16x128xf32, #tpu.memory_space<vmem>>, vector<1x16x128xf32>
    %108 = vector.shape_cast %107 : vector<1x16x128xf32> to vector<16x128xf32>
    %109 = arith.addf %105, %108 : vector<16x128xf32>
    %110 = arith.index_cast %c2_i32 : i32 to index
    %c0_66 = arith.constant 0 : index
    %c0_67 = arith.constant 0 : index
    %111 = vector.load %arg20[%110, %c0_66, %c0_67] : memref<8x16x128xf32, #tpu.memory_space<vmem>>, vector<1x16x128xf32>
    %112 = vector.shape_cast %111 : vector<1x16x128xf32> to vector<16x128xf32>
    %113 = vector.shape_cast %109 : vector<16x128xf32> to vector<1x16x128xf32>
    tpu.vector_store %arg20[%110, %c0_66, %c0_67], %113 {strides = array<i32>} : memref<8x16x128xf32, #tpu.memory_space<vmem>>, vector<1x16x128xf32>,
    %c3_i32 = arith.constant 3 : i32
    %114 = arith.index_cast %c3_i32 : i32 to index
    %c0_68 = arith.constant 0 : index
    %c0_69 = arith.constant 0 : index
    %115 = vector.load %arg18[%114, %c0_68, %c0_69] : memref<8x16x128xf32, #tpu.memory_space<vmem>>, vector<1x16x128xf32>
    %116 = vector.shape_cast %115 : vector<1x16x128xf32> to vector<16x128xf32>
    %117 = arith.mulf %116, %109 : vector<16x128xf32>
    %118 = arith.index_cast %c3_i32 : i32 to index
    %c0_70 = arith.constant 0 : index
    %c0_71 = arith.constant 0 : index
    %119 = vector.load %arg19[%118, %c0_70, %c0_71] : memref<8x16x128xf32, #tpu.memory_space<vmem>>, vector<1x16x128xf32>
    %120 = vector.shape_cast %119 : vector<1x16x128xf32> to vector<16x128xf32>
    %121 = arith.addf %117, %120 : vector<16x128xf32>
    %122 = arith.index_cast %c3_i32 : i32 to index
    %c0_72 = arith.constant 0 : index
    %c0_73 = arith.constant 0 : index
    %123 = vector.load %arg20[%122, %c0_72, %c0_73] : memref<8x16x128xf32, #tpu.memory_space<vmem>>, vector<1x16x128xf32>
    %124 = vector.shape_cast %123 : vector<1x16x128xf32> to vector<16x128xf32>
    %125 = vector.shape_cast %121 : vector<16x128xf32> to vector<1x16x128xf32>
    tpu.vector_store %arg20[%122, %c0_72, %c0_73], %125 {strides = array<i32>} : memref<8x16x128xf32, #tpu.memory_space<vmem>>, vector<1x16x128xf32>,
    %c4_i32 = arith.constant 4 : i32
    %126 = arith.index_cast %c4_i32 : i32 to index
    %c0_74 = arith.constant 0 : index
    %c0_75 = arith.constant 0 : index
    %127 = vector.load %arg18[%126, %c0_74, %c0_75] : memref<8x16x128xf32, #tpu.memory_space<vmem>>, vector<1x16x128xf32>
    %128 = vector.shape_cast %127 : vector<1x16x128xf32> to vector<16x128xf32>
    %129 = arith.mulf %128, %121 : vector<16x128xf32>
    %130 = arith.index_cast %c4_i32 : i32 to index
    %c0_76 = arith.constant 0 : index
    %c0_77 = arith.constant 0 : index
    %131 = vector.load %arg19[%130, %c0_76, %c0_77] : memref<8x16x128xf32, #tpu.memory_space<vmem>>, vector<1x16x128xf32>
    %132 = vector.shape_cast %131 : vector<1x16x128xf32> to vector<16x128xf32>
    %133 = arith.addf %129, %132 : vector<16x128xf32>
    %134 = arith.index_cast %c4_i32 : i32 to index
    %c0_78 = arith.constant 0 : index
    %c0_79 = arith.constant 0 : index
    %135 = vector.load %arg20[%134, %c0_78, %c0_79] : memref<8x16x128xf32, #tpu.memory_space<vmem>>, vector<1x16x128xf32>
    %136 = vector.shape_cast %135 : vector<1x16x128xf32> to vector<16x128xf32>
    %137 = vector.shape_cast %133 : vector<16x128xf32> to vector<1x16x128xf32>
    tpu.vector_store %arg20[%134, %c0_78, %c0_79], %137 {strides = array<i32>} : memref<8x16x128xf32, #tpu.memory_space<vmem>>, vector<1x16x128xf32>,
    %c5_i32 = arith.constant 5 : i32
    %138 = arith.index_cast %c5_i32 : i32 to index
    %c0_80 = arith.constant 0 : index
    %c0_81 = arith.constant 0 : index
    %139 = vector.load %arg18[%138, %c0_80, %c0_81] : memref<8x16x128xf32, #tpu.memory_space<vmem>>, vector<1x16x128xf32>
    %140 = vector.shape_cast %139 : vector<1x16x128xf32> to vector<16x128xf32>
    %141 = arith.mulf %140, %133 : vector<16x128xf32>
    %142 = arith.index_cast %c5_i32 : i32 to index
    %c0_82 = arith.constant 0 : index
    %c0_83 = arith.constant 0 : index
    %143 = vector.load %arg19[%142, %c0_82, %c0_83] : memref<8x16x128xf32, #tpu.memory_space<vmem>>, vector<1x16x128xf32>
    %144 = vector.shape_cast %143 : vector<1x16x128xf32> to vector<16x128xf32>
    %145 = arith.addf %141, %144 : vector<16x128xf32>
    %146 = arith.index_cast %c5_i32 : i32 to index
    %c0_84 = arith.constant 0 : index
    %c0_85 = arith.constant 0 : index
    %147 = vector.load %arg20[%146, %c0_84, %c0_85] : memref<8x16x128xf32, #tpu.memory_space<vmem>>, vector<1x16x128xf32>
    %148 = vector.shape_cast %147 : vector<1x16x128xf32> to vector<16x128xf32>
    %149 = vector.shape_cast %145 : vector<16x128xf32> to vector<1x16x128xf32>
    tpu.vector_store %arg20[%146, %c0_84, %c0_85], %149 {strides = array<i32>} : memref<8x16x128xf32, #tpu.memory_space<vmem>>, vector<1x16x128xf32>,
    %c6_i32 = arith.constant 6 : i32
    %150 = arith.index_cast %c6_i32 : i32 to index
    %c0_86 = arith.constant 0 : index
    %c0_87 = arith.constant 0 : index
    %151 = vector.load %arg18[%150, %c0_86, %c0_87] : memref<8x16x128xf32, #tpu.memory_space<vmem>>, vector<1x16x128xf32>
    %152 = vector.shape_cast %151 : vector<1x16x128xf32> to vector<16x128xf32>
    %153 = arith.mulf %152, %145 : vector<16x128xf32>
    %154 = arith.index_cast %c6_i32 : i32 to index
    %c0_88 = arith.constant 0 : index
    %c0_89 = arith.constant 0 : index
    %155 = vector.load %arg19[%154, %c0_88, %c0_89] : memref<8x16x128xf32, #tpu.memory_space<vmem>>, vector<1x16x128xf32>
    %156 = vector.shape_cast %155 : vector<1x16x128xf32> to vector<16x128xf32>
    %157 = arith.addf %153, %156 : vector<16x128xf32>
    %158 = arith.index_cast %c6_i32 : i32 to index
    %c0_90 = arith.constant 0 : index
    %c0_91 = arith.constant 0 : index
    %159 = vector.load %arg20[%158, %c0_90, %c0_91] : memref<8x16x128xf32, #tpu.memory_space<vmem>>, vector<1x16x128xf32>
    %160 = vector.shape_cast %159 : vector<1x16x128xf32> to vector<16x128xf32>
    %161 = vector.shape_cast %157 : vector<16x128xf32> to vector<1x16x128xf32>
    tpu.vector_store %arg20[%158, %c0_90, %c0_91], %161 {strides = array<i32>} : memref<8x16x128xf32, #tpu.memory_space<vmem>>, vector<1x16x128xf32>,
    %c7_i32 = arith.constant 7 : i32
    %162 = arith.index_cast %c7_i32 : i32 to index
    %c0_92 = arith.constant 0 : index
    %c0_93 = arith.constant 0 : index
    %163 = vector.load %arg18[%162, %c0_92, %c0_93] : memref<8x16x128xf32, #tpu.memory_space<vmem>>, vector<1x16x128xf32>
    %164 = vector.shape_cast %163 : vector<1x16x128xf32> to vector<16x128xf32>
    %165 = arith.mulf %164, %157 : vector<16x128xf32>
    %166 = arith.index_cast %c7_i32 : i32 to index
    %c0_94 = arith.constant 0 : index
    %c0_95 = arith.constant 0 : index
    %167 = vector.load %arg19[%166, %c0_94, %c0_95] : memref<8x16x128xf32, #tpu.memory_space<vmem>>, vector<1x16x128xf32>
    %168 = vector.shape_cast %167 : vector<1x16x128xf32> to vector<16x128xf32>
    %169 = arith.addf %165, %168 : vector<16x128xf32>
    %170 = arith.index_cast %c7_i32 : i32 to index
    %c0_96 = arith.constant 0 : index
    %c0_97 = arith.constant 0 : index
    %171 = vector.load %arg20[%170, %c0_96, %c0_97] : memref<8x16x128xf32, #tpu.memory_space<vmem>>, vector<1x16x128xf32>
    %172 = vector.shape_cast %171 : vector<1x16x128xf32> to vector<16x128xf32>
    %173 = vector.shape_cast %169 : vector<16x128xf32> to vector<1x16x128xf32>
    tpu.vector_store %arg20[%170, %c0_96, %c0_97], %173 {strides = array<i32>} : memref<8x16x128xf32, #tpu.memory_space<vmem>>, vector<1x16x128xf32>,
    %c8_i32_98 = arith.constant 8 : i32
    %c0_99 = arith.constant 0 : index
    %c0_100 = arith.constant 0 : index
    %c0_101 = arith.constant 0 : index
    %174 = vector.load %arg20[%c0_99, %c0_100, %c0_101] : memref<8x16x128xf32, #tpu.memory_space<vmem>>, vector<8x16x128xf32>
    %175 = vector.shape_cast %64 : vector<8x16xf32> to vector<8x16x1xf32>
    %176 = vector.broadcast %175 : vector<8x16x1xf32> to vector<8x16x128xf32>
    %177 = arith.mulf %174, %176 : vector<8x16x128xf32>
    %cst_102 = arith.constant dense<0.000000e+00> : vector<8x128xf32>
    %178 = vector.multi_reduction <add>, %177, %cst_102 [1] : vector<8x16x128xf32> to vector<8x128xf32>
    %179 = arith.index_cast %56 : i32 to index
    %c0_103 = arith.constant 0 : index
    %180 = vector.load %arg17[%179, %c0_103] : memref<8x128xf32, #tpu.memory_space<vmem>>, vector<8x128xf32>
    tpu.vector_store %arg17[%179, %c0_103], %178 {strides = array<i32>} : memref<8x128xf32, #tpu.memory_space<vmem>>, vector<8x128xf32>,
    %c1_i32_104 = arith.constant 1 : i32
    %c0_105 = arith.constant 0 : index
    %c0_106 = arith.constant 0 : index
    %181 = vector.load %arg17[%c0_105, %c0_106] : memref<8x128xf32, #tpu.memory_space<vmem>>, vector<8x128xf32>
    %c0_107 = arith.constant 0 : index
    %c0_108 = arith.constant 0 : index
    %182 = vector.load %arg10[%c0_107, %c0_108] : memref<1x128xf32, #tpu.memory_space<vmem>>, vector<1x128xf32>
    %c0_109 = arith.constant 0 : index
    %c0_110 = arith.constant 0 : index
    %183 = vector.load %arg14[%c0_109, %c0_110] : memref<8x128xf32, #tpu.memory_space<vmem>>, vector<8x128xf32>
    %184 = vector.broadcast %182 : vector<1x128xf32> to vector<8x128xf32>
    %185 = arith.mulf %184, %183 : vector<8x128xf32>
    %186 = arith.addf %181, %185 : vector<8x128xf32>
    %187 = arith.truncf %186 : vector<8x128xf32> to vector<8x128xbf16>
    %c0_111 = arith.constant 0 : index
    %c0_112 = arith.constant 0 : index
    %188 = vector.load %arg11[%c0_111, %c0_112] : memref<128x128xbf16, #tpu.memory_space<vmem>>, vector<128x128xbf16>
    %cst_113 = arith.constant dense<0.000000e+00> : vector<8x128xf32>
    %189 = tpu.matmul %187, %188, %cst_113 {dimension_numbers = #tpu.dot_dimension_numbers<[1], [0], [0], [1], [0, 0, 1, 1], [], []>} : vector<8x128xbf16>, vector<128x128xbf16>, vector<8x128xf32> -> vector<8x128xf32>
    %c0_114 = arith.constant 0 : index
    %c0_115 = arith.constant 0 : index
    %c0_116 = arith.constant 0 : index
    %190 = vector.load %arg12[%c0_114, %c0_115, %c0_116] : memref<1x8x128xf32, #tpu.memory_space<vmem>>, vector<1x8x128xf32>
    %191 = vector.shape_cast %190 : vector<1x8x128xf32> to vector<8x128xf32>
    %192 = vector.shape_cast %189 : vector<8x128xf32> to vector<1x8x128xf32>
    tpu.vector_store %arg12[%c0_114, %c0_115, %c0_116], %192 {strides = array<i32>} : memref<1x8x128xf32, #tpu.memory_space<vmem>>, vector<1x8x128xf32>,
    return
  }
  func.func @transform_0(%arg0: i32) -> (i32, i32, i32) {
    %c0_i32 = arith.constant 0 : i32
    %c0_i32_0 = arith.constant 0 : i32
    %c0_i32_1 = arith.constant 0 : i32
    return %arg0, %c0_i32, %c0_i32_0 : i32, i32, i32
  }
  func.func @transform_1(%arg0: i32) -> (i32, i32) {
    %c0_i32 = arith.constant 0 : i32
    %c0_i32_0 = arith.constant 0 : i32
    %c0_i32_1 = arith.constant 0 : i32
    return %c0_i32, %c0_i32_0 : i32, i32
  }
  func.func @transform_2(%arg0: i32) -> (i32, i32) {
    %c0_i32 = arith.constant 0 : i32
    %c0_i32_0 = arith.constant 0 : i32
    %c0_i32_1 = arith.constant 0 : i32
    return %c0_i32, %c0_i32_0 : i32, i32
  }
  func.func @transform_3(%arg0: i32) -> (i32, i32) {
    %c0_i32 = arith.constant 0 : i32
    %c0_i32_0 = arith.constant 0 : i32
    %c0_i32_1 = arith.constant 0 : i32
    return %c0_i32, %c0_i32_0 : i32, i32
  }
  func.func @transform_4(%arg0: i32) -> (i32, i32) {
    %c0_i32 = arith.constant 0 : i32
    %c0_i32_0 = arith.constant 0 : i32
    %c0_i32_1 = arith.constant 0 : i32
    return %c0_i32, %c0_i32_0 : i32, i32
  }
  func.func @transform_5(%arg0: i32) -> (i32, i32) {
    %c0_i32 = arith.constant 0 : i32
    %c0_i32_0 = arith.constant 0 : i32
    %c0_i32_1 = arith.constant 0 : i32
    return %c0_i32, %c0_i32_0 : i32, i32
  }
  func.func @transform_6(%arg0: i32) -> (i32, i32) {
    %c0_i32 = arith.constant 0 : i32
    %c0_i32_0 = arith.constant 0 : i32
    %c0_i32_1 = arith.constant 0 : i32
    return %c0_i32, %c0_i32_0 : i32, i32
  }
  func.func @transform_7(%arg0: i32) -> (i32, i32) {
    %c0_i32 = arith.constant 0 : i32
    %c0_i32_0 = arith.constant 0 : i32
    %c0_i32_1 = arith.constant 0 : i32
    return %c0_i32, %c0_i32_0 : i32, i32
  }
  func.func @transform_8(%arg0: i32) -> (i32, i32) {
    %c0_i32 = arith.constant 0 : i32
    %c0_i32_0 = arith.constant 0 : i32
    %c0_i32_1 = arith.constant 0 : i32
    return %c0_i32, %c0_i32_0 : i32, i32
  }
  func.func @transform_9(%arg0: i32) -> (i32, i32) {
    %c0_i32 = arith.constant 0 : i32
    %c0_i32_0 = arith.constant 0 : i32
    %c0_i32_1 = arith.constant 0 : i32
    return %c0_i32, %c0_i32_0 : i32, i32
  }
  func.func @transform_10(%arg0: i32) -> (i32, i32) {
    %c0_i32 = arith.constant 0 : i32
    %c0_i32_0 = arith.constant 0 : i32
    %c0_i32_1 = arith.constant 0 : i32
    return %c0_i32, %c0_i32_0 : i32, i32
  }
  func.func @transform_11(%arg0: i32) -> (i32, i32, i32) {
    %c0_i32 = arith.constant 0 : i32
    %c0_i32_0 = arith.constant 0 : i32
    %c0_i32_1 = arith.constant 0 : i32
    return %arg0, %c0_i32, %c0_i32_0 : i32, i32, i32
  }
}

</mosaic_0001>

<bundles_post_ra>
// kernel: tpu_custom_call.1
= control target key start
LH: loop header
LB: loop body
LE: loop exit
PB: predicated region body
PF: predicated region fallthrough
CT: control target
= control target key end

     0   :  { %s2443_s0 = inlined_call_operand.vmem [shape: bf16[2,8,128], index: 0, kind: input, shape index: {}]   ;;  %s2444_s1 = inlined_call_operand.vmem [shape: bf16[128,128], index: 1, kind: input, shape index: {}]   ;;  %s2445_s2 = inlined_call_operand.vmem [shape: bf16[8,8], index: 2, kind: input, shape index: {}]   ;;  %s2446_s3 = inlined_call_operand.vmem [shape: bf16[8,8], index: 3, kind: input, shape index: {}]   ;;  %s2447_s4 = inlined_call_operand.vmem [shape: bf16[8,8], index: 4, kind: input, shape index: {}]   ;;  %s2448_s5 = inlined_call_operand.vmem [shape: f32[8,1], index: 5, kind: input, shape index: {}]   ;;  %s2449_s6 = inlined_call_operand.vmem [shape: bf16[128,160], index: 6, kind: input, shape index: {}]   ;;  %s2450_s7 = inlined_call_operand.vmem [shape: f32[1,128], index: 7, kind: input, shape index: {}]   ;;  %s2451_s8 = inlined_call_operand.vmem [shape: f32[16,128], index: 8, kind: input, shape index: {}]   ;;  %s2452_s9 = inlined_call_operand.vmem [shape: f32[1,128], index: 9, kind: input, shape index: {}]   ;;  %s2453_s10 = inlined_call_operand.vmem [shape: bf16[128,128], index: 10, kind: input, shape index: {}]   ;;  %s2454_s11 = inlined_call_operand.hbm [shape: f32[2,8,128], index: 11, kind: output, shape index: {}]  }
   0x1   :  { %2455 = sst [smem:[#allocation13_spill]] %s2443_s0 }
   0x2   :  { %16 = vsyncpa [#allocation11], 0 }
   0x3   :  { %18 = vsyncpa [#allocation11 + $0x1], 0  ;;  %s2063_s17 = smov 0   ;;  %s2065_s18 = smov 0  }
   0x4   :  { %s2067_s19 = smov 0   ;;  %s2069_s20 = smov 0  }
   0x5 LB: > { %s2084_s21 = sadd.s32 4294967295, %s1993_s20   ;;  %s1678_s22 = sadd.s32 4294967294, %s1993_s20   ;;  %s1993_s20 = sphi %s2069_s20, %s2462_s20   ;;  %s1989_s19 = sphi %s2067_s19, %s2461_s19   ;;  %s1985_s18 = sphi %s2065_s18, %s2460_s18   ;;  %s1981_s17 = sphi %s2063_s17, %s2459_s17  }
   0x6   : > { %s2088_s23 = sadd.s32 1, %s1993_s20   ;;  %s267_s24 = sadd.s32 1, %s1989_s19 }
   0x7   : > { %s264_s25 = ssub.s32 %s1993_s20, %s2088_s23  ;;  %p277_p0 = scmp.ne.s32.totalorder %s1989_s19, %s1985_s18 }
   0x8   : > { %p265_p1 = scmp.eq.s32.totalorder %s264_s25, 0  ;;  %p278_p2 = scmp.eq.s32.totalorder %s2084_s21, 1 }
   0x9   : > { %p283_p3 = scmp.ne.s32.totalorder %s1985_s18, %s1981_s17  ;;  %p284_p4 = scmp.eq.s32.totalorder %s1678_s22, 1 }
   0xa   : > { %s2099_s26 = scalar_select %p265_p1, %s1989_s19, %s267_s24  }
   0xb   : > { %p2101_p5 = por %p278_p2, %p277_p0  ;;  %p2105_p6 = por %p284_p4, %p283_p3 }
   0xc   : > { %p1681_p7 = scmp.ge.s32.totalorder %s1993_s20, 1  ;;  %p339_p8 = scmp.lt.s32.totalorder %s1993_s20, 3 }
   0xe   : > { %p340_p9 = pnand %p1681_p7, %p339_p8 }
   0xf   : > { %v1855_v0 = vld [vmem:[%s2444_s1] sm:$0xff] (!%p340_p9)   ;;  %v1995_v1 = vmov (!%p340_p9), 0.0   ;;  %v1856_v2 = vld [vmem:[%s2444_s1 + $0x8] sm:$0xff] (!%p340_p9)   ;;  %vm1996_vm0 = vmmov (!%p340_p9), 0   ;;  %v1857_v3 = vld [vmem:[%s2444_s1 + $0x10] sm:$0xff] (!%p340_p9)   ;;  %p378_p10 = scmp.lt.s32.totalorder (!%p340_p9), %s2084_s21, 1  ;;  %v488_v16 = vlaneseq (!%p340_p9) }
  0x10   : > { %343 = sbr.rel (%p340_p9) target bundleno = 1345 (0x541), region = 64  ;;  %1749 = vmatprep.subr.bf16.mxu0 (!%p340_p9), %v1995_v1  ;;  %1769 = vmatprep.subr.bf16.mxu1 (!%p340_p9), %v1995_v1  ;;  %v1858_v4 = vld [vmem:[%s2444_s1 + $0x18] sm:$0xff] (!%p340_p9)   ;;  %v1859_v5 = vld [vmem:[%s2444_s1 + $0x20] sm:$0xff] (!%p340_p9)   ;;  %v1860_v6 = vld [vmem:[%s2444_s1 + $0x28] sm:$0xff] (!%p340_p9)   ;;  %s2458_s0 = sld [smem:[#allocation13_spill]] (!%p340_p9)  ;;  %v1999_v15 = vmov (!%p340_p9), 0  }
  0x11   : > { %1750 = vmatpush3.bf16.msra.mxu0 (!%p340_p9), %v1855_v0  ;;  %1765 = vmatprep.mubr.msk.bf16.mxu0 (!%p340_p9), %vm1996_vm0, %v1995_v1  ;;  %v1861_v7 = vld [vmem:[%s2444_s1 + $0x30] sm:$0xff] (!%p340_p9)   ;;  %v1862_v8 = vld [vmem:[%s2444_s1 + $0x38] sm:$0xff] (!%p340_p9)   ;;  %s1997_s30 = smov (!%p340_p9), 1   ;;  %v645_v14 = vld [vmem:[%s2448_s5] sm:$0xff] (!%p340_p9)  ;;  %v489_v17 = vand.u32 (!%p340_p9), 127, %v488_v16  ;;  %vm506_vm2 = vcmask (!%p340_p9), 1043456  }
  0x12   : > { %1751 = vmatprep.subr.bf16.mxu0 (!%p340_p9), %v1995_v1  ;;  %1771 = vmatprep.mubr.msk.bf16.mxu1 (!%p340_p9), %vm1996_vm0, %v1995_v1  ;;  %v500_v23 = vld [vmem:[%s2445_s2] sm:$0xf] (!%p340_p9)  ;;  %vm502_vm3 = vcmask (!%p340_p9), 64512   ;;  %v1865_v29 = vld [vmem:[%s2449_s6 + $0x4] ss:$8 sps:$4 sm:$0xff] (!%p340_p9)   ;;  %vm809_vm5 = vcmask (!%p340_p9), 130048  }
  0x13   : > { %1853 = vset.pattern.permute.xlu1 (!%p340_p9), %v1999_v15  ;;  %1854 = vset.pattern.permute.xlu0 (!%p340_p9), %v1999_v15  ;;  %vm490_vm1 = vcmp.eq.s32.totalorder (!%p340_p9), %v489_v17, 0  ;;  %vm494_vm4 = vcmp.eq.s32.totalorder (!%p340_p9), %v489_v17, 127  ;;  %v498_v28 = vld [vmem:[%s2446_s3] sm:$0xf] (!%p340_p9)  ;;  %v1868_v33 = vld [vmem:[%s2449_s6 + $0x14] ss:$8 sps:$4 sm:$0xff] (!%p340_p9)  }
  0x14   : > { %648 = vperm.xlu1 (!%p340_p9), %1853, %v645_v14   ;;  %v596_v31 = vld [vmem:[%s2447_s4] sm:$0xf] (!%p340_p9)  ;;  %v1866_v34 = vld [vmem:[%s2449_s6 + $0x10] ss:$8 sps:$4 sm:$0xff] (!%p340_p9)   ;;  %v1871_v35 = vld [vmem:[%s2449_s6 + $0x24] ss:$8 sps:$4 sm:$0xff] (!%p340_p9)  }
  0x15   : > { %1752 = vmatpush3.bf16.msra.mxu0 (!%p340_p9), %v1856_v2  ;;  %v1863_v32 = vld [vmem:[%s2449_s6] ss:$8 sps:$4 sm:$0xff] (!%p340_p9)   ;;  %v1874_v37 = vld [vmem:[%s2449_s6 + $0x34] ss:$8 sps:$4 sm:$0xff] (!%p340_p9)   ;;  %v1872_v38 = vld [vmem:[%s2449_s6 + $0x30] ss:$8 sps:$4 sm:$0xff] (!%p340_p9)  }
  0x16   : > { %1753 = vmatprep.subr.bf16.mxu0 (!%p340_p9), %v1995_v1  ;;  %v1869_v36 = vld [vmem:[%s2449_s6 + $0x20] ss:$8 sps:$4 sm:$0xff] (!%p340_p9)   ;;  %v1877_v39 = vld [vmem:[%s2449_s6 + $0x44] ss:$8 sps:$4 sm:$0xff] (!%p340_p9)   ;;  %v1880_v41 = vld [vmem:[%s2449_s6 + $0x54] ss:$8 sps:$4 sm:$0xff] (!%p340_p9)  }
  0x17   : > { %s379_s12 = scalar_select %p378_p10, %s2084_s21, 1  ;;  %v1875_v40 = vld [vmem:[%s2449_s6 + $0x40] ss:$8 sps:$4 sm:$0xff]   ;;  %v1878_v42 = vld [vmem:[%s2449_s6 + $0x50] ss:$8 sps:$4 sm:$0xff]   ;;  %vm1472_vm6 = vcmask 1041409  }
  0x18   : > { %v1883_v43 = vld [vmem:[%s2449_s6 + $0x64] ss:$8 sps:$4 sm:$0xff]   ;;  %v1881_v44 = vld [vmem:[%s2449_s6 + $0x60] ss:$8 sps:$4 sm:$0xff]   ;;  %v1886_v45 = vld [vmem:[%s2449_s6 + $0x74] ss:$8 sps:$4 sm:$0xff]  }
  0x19   : > { %1754 = vmatpush3.bf16.msra.mxu0 %v1857_v3  ;;  %s1683_s15 = sshll.u32 %s379_s12, 2  ;;  %s1998_s12 = smov 127   ;;  %v1884_v46 = vld [vmem:[%s2449_s6 + $0x70] ss:$8 sps:$4 sm:$0xff]   ;;  %v2234_v3 = vshrl.u32 %v488_v16, 7  ;;  %vm1474_vm7 = vcmask 1042434  }
  0x1a   : > { %1755 = vmatprep.subr.bf16.mxu0 %v1995_v1  ;;  %s381_s29 = scalar_lea.vmem %s2458_s0, %s1683_s15  ;;  %s2000_s13 = smov 112   ;;  %vm1476_vm8 = vcmask 1043459   ;;  %vm1478_vm9 = vcmask 1044484   ;;  %vm1480_vm10 = vcmask 1045509   ;;  %vm1482_vm11 = vcmask 1046534  }
  0x1b   : > { %v383_v9 = vld [vmem:[%s381_s29] sm:$0xf]  ;;  %v1084_v17 = vsub.s32 5, %v2234_v3  ;;  %vm1484_vm12 = vcmask 1047559   ;;  %s375_s24 = sand.u32 1, %s1985_s18  }
  0x1c   : > { %s1682_s25 = sshll.u32 %s375_s24, 3  ;;  %s1606_s16 = scalar_lea.sflag [#allocation11], %s375_s24 }
  0x1d   : > { %1756 = vmatpush3.bf16.msra.mxu0 %v1858_v4  ;;  %s377_s29 = scalar_lea.vmem [#allocation10], %s1682_s25 }
  0x1e   : > { %1757 = vmatprep.subr.bf16.mxu0 %v1995_v1 }
  0x21   : > { %1758 = vmatpush3.bf16.msra.mxu0 %v1859_v5 }
  0x22   : > { %1759 = vmatprep.subr.bf16.mxu0 %v1995_v1 }
  0x25   : > { %1760 = vmatpush3.bf16.msra.mxu0 %v1860_v6  ;;  %v2238_v6 = vsub.s32 0, %v2234_v3 }
  0x26   : > { %1761 = vmatprep.subr.bf16.mxu0 %v1995_v1 }
  0x29   : > { %1762 = vmatpush3.bf16.msra.mxu0 %v1861_v7 }
  0x2a   : > { %1763 = vmatprep.subr.bf16.mxu0 %v1995_v1 }
  0x2d   : > { %1764 = vmatpush3.bf16.msra.mxu0 %v1862_v8 }
  0x2e   : > { %1787 = vmatprep.subr.bf16.mxu0 %v1995_v1 }
  0x30   : > { %1766 = vmatmul.mubr.bf16.vlgmr.msra.gmra.mrb[0].mxu0 %v383_v9  ;;  %v1040_v9 = vsub.s32 1, %v2234_v3 }
  0x31   : > { %1803 = vmatprep.mubr.msk.bf16.mxu0 %vm1996_vm0, %v1995_v1 }
  0x93   : > { %v649_v57 = vpop.permute.xlu1 %648 }
 0x103   : > { %v482_v10 = vpop.f32.mrb[0].mxu0 }
 0x104   : > { %491 = vrot.lane.b32.xlu0 %v482_v10, %s1997_s30  ;;  %v1767_v11 = vpop.f32.mrb[1].mxu0  ;;  %v499_v21 = vpack.c.bf16 %v482_v10, %v482_v10  ;;  %s1619_s30 = sshll.u32 %s377_s29, 4  ;;  %s2398_s30 = int_to_ptr.vmem [resolvable:$true] %s1619_s30 }
 0x105   : > { %v485_v12 = vpop.f32.mrb[2].mxu0  ;;  %v1051_v11 = vsub.s32 2, %v2234_v3  ;;  %s1931_s22 = scalar_lea.vmem %s2398_s30, 128 }
 0x106   : > { %v1768_v13 = vpop.f32.mrb[3].mxu0  ;;  %v554_v25 = vsel %vm506_vm2, %v499_v21, 0  ;;  %v1106_v21 = vsub.s32 7, %v2234_v3  ;;  %p1932_p11 = scmp.ne.s32.totalorder %s2398_s30, %s1931_s22 }
 0x107   : > { %v1062_v13 = vsub.s32 3, %v2234_v3 }
 0x108   : > { %495 = vrot.lane.b32.xlu0 %v482_v10, %s1998_s12  ;;  %s1722_s12 = sshll.u32 %s2084_s21, 7  ;;  %p1933_p12 = pnand %p1932_p11, %p2101_p5 }
 0x109   : > { %s2403_s15 = scalar_lea.hbm %s2454_s11, %s1722_s12  ;;  %s2002_s21 = smov [#allocation10]  }
 0x10a   : > { %p1934_p13 = pneg %p1933_p12  ;;  %s1935_s25 = sshll.u32 %s2002_s21, 4  ;;  %s1936_s25 = int_to_ptr.vmem [resolvable:$false] %s1935_s25 }
 0x10b   : > { %s1937_s0 = scalar_lea.vmem %s1936_s25, 256  ;;  %p1938_p0 = scmp.lt.s32.totalorder %s2398_s30, %s1936_s25 }
 0x10c   : > { %p1939_p1 = scmp.lt.s32.totalorder %s1937_s0, %s1931_s22 }
 0x10e   : > { %p1940_p2 = por %p1939_p1, %p1938_p0 }
 0x110   : > { %p1941_p3 = pnand %p1940_p2, %p1934_p13 }
 0x176   : > { %v492_v18 = vpop.permute.xlu0 %491 }
 0x177   : > { %v493_v19 = vsel %vm490_vm1, 0.0, %v492_v18 }
 0x178   : > { %v501_v20 = vpack.c.bf16 %v493_v19, %v493_v19  ;;  %v1095_v19 = vsub.s32 6, %v2234_v3 }
 0x17a   : > { %v508_v22 = vsel %vm506_vm2, %v501_v20, 0  ;;  %v496_v24 = vpop.permute.xlu0 %495 }
 0x17b   : > { %1770 = vmatpush3.bf16.msra.mxu1 %v508_v22  ;;  %v497_v26 = vsel %vm494_vm4, 0.0, %v496_v24  ;;  %v1711_v24 = vld [vmem:[%s2450_s7] ss:$0 sm:$0xff] }
 0x17c   : > { %1775 = vmatprep.subr.bf16.mxu1 %v1995_v1  ;;  %v597_v27 = vpack.c.bf16 %v497_v26, %v497_v26 }
 0x17e   : > { %1772 = vmatmul.mubr.msk.bf16.vlgmr.msra.gmra.mrb[0].mxu1 %vm502_vm3, %v500_v23  ;;  %v602_v30 = vsel %vm506_vm2, %v597_v27, 0 }
 0x17f   : > { %1776 = vmatpush3.bf16.msra.mxu1 %v554_v25  ;;  %1777 = vmatprep.mubr.msk.bf16.mxu1 %vm1996_vm0, %v1995_v1 }
 0x180   : > { %1781 = vmatprep.subr.bf16.mxu1 %v1995_v1 }
 0x186   : > { %1778 = vmatmul.mubr.msk.bf16.vlgmr.msra.gmra.mrb[4].mxu1 %vm502_vm3, %v498_v28 }
 0x187   : > { %1782 = vmatpush3.bf16.msra.mxu1 %v602_v30  ;;  %1783 = vmatprep.mubr.msk.bf16.mxu1 %vm1996_vm0, %v1995_v1 }
 0x188   : > { %749 = vmatprep.subr.bf16.mxu1 %v1865_v29 }
 0x18e   : > { %1784 = vmatmul.mubr.msk.bf16.vlgmr.msra.gmra.mrb[8].mxu1 %vm502_vm3, %v596_v31 }
 0x18f   : > { %750 = vmatpush1.bf16.msra.mxu1 %v1863_v32  ;;  %781 = vmatprep.mubr.bf16.mxu1 %v1999_v15  ;;  %v1073_v15 = vsub.s32 4, %v2234_v3 }
 0x190   : > { %751 = vmatprep.subr.bf16.mxu1 %v1868_v33 }
 0x193   : > { %752 = vmatpush1.bf16.msra.mxu1 %v1866_v34 }
 0x194   : > { %753 = vmatprep.subr.bf16.mxu1 %v1871_v35  ;;  %v1887_v35 = vld [vmem:[%s2453_s10] sm:$0xff]  }
 0x195   : > { %1788 = vmatpush3.bf16.msra.mxu0 %v1887_v35 }
 0x196   : > { %1789 = vmatprep.subr.bf16.mxu0 %v1995_v1 }
 0x197   : > { %754 = vmatpush1.bf16.msra.mxu1 %v1869_v36 }
 0x198   : > { %755 = vmatprep.subr.bf16.mxu1 %v1874_v37  ;;  %v1888_v37 = vld [vmem:[%s2453_s10 + $0x8] sm:$0xff]  }
 0x199   : > { %1790 = vmatpush3.bf16.msra.mxu0 %v1888_v37 }
 0x19a   : > { %1791 = vmatprep.subr.bf16.mxu0 %v1995_v1 }
 0x19b   : > { %756 = vmatpush1.bf16.msra.mxu1 %v1872_v38 }
 0x19c   : > { %757 = vmatprep.subr.bf16.mxu1 %v1877_v39 }
 0x19f   : > { %758 = vmatpush1.bf16.msra.mxu1 %v1875_v40 }
 0x1a0   : > { %759 = vmatprep.subr.bf16.mxu1 %v1880_v41  ;;  %v1889_v41 = vld [vmem:[%s2453_s10 + $0x10] sm:$0xff]  }
 0x1a1   : > { %1792 = vmatpush3.bf16.msra.mxu0 %v1889_v41 }
 0x1a2   : > { %1793 = vmatprep.subr.bf16.mxu0 %v1995_v1 }
 0x1a3   : > { %760 = vmatpush1.bf16.msra.mxu1 %v1878_v42 }
 0x1a4   : > { %761 = vmatprep.subr.bf16.mxu1 %v1883_v43  ;;  %v1890_v43 = vld [vmem:[%s2453_s10 + $0x18] sm:$0xff]  }
 0x1a5   : > { %1794 = vmatpush3.bf16.msra.mxu0 %v1890_v43 }
 0x1a6   : > { %1795 = vmatprep.subr.bf16.mxu0 %v1995_v1 }
 0x1a7   : > { %762 = vmatpush1.bf16.msra.mxu1 %v1881_v44  ;;  %v1891_v44 = vld [vmem:[%s2453_s10 + $0x20] sm:$0xff]  }
 0x1a8   : > { %763 = vmatprep.subr.bf16.mxu1 %v1886_v45  ;;  %v1892_v45 = vld [vmem:[%s2453_s10 + $0x28] sm:$0xff]  }
 0x1a9   : > { %1796 = vmatpush3.bf16.msra.mxu0 %v1891_v44 }
 0x1aa   : > { %1797 = vmatprep.subr.bf16.mxu0 %v1995_v1 }
 0x1ab   : > { %764 = vmatpush1.bf16.msra.mxu1 %v1884_v46  ;;  %v2001_v46 = vmov 1966171168  }
 0x1ad   : > { %1798 = vmatpush3.bf16.msra.mxu0 %v1892_v45 }
 0x1ae   : > { %1799 = vmatprep.subr.bf16.mxu0 %v1995_v1 }
 0x251   : > { %v544_v47 = vpop.f32.mrb[0].mxu1 }
 0x252   : > { %v1773_v48 = vpop.f32.mrb[1].mxu1 }
 0x253   : > { %v547_v49 = vpop.f32.mrb[2].mxu1 }
 0x254   : > { %v1774_v50 = vpop.f32.mrb[3].mxu1  ;;  %v1893_v49 = vld [vmem:[%s2453_s10 + $0x30] sm:$0xff]  }
 0x255   : > { %1800 = vmatpush3.bf16.msra.mxu0 %v1893_v49 }
 0x256   : > { %1801 = vmatprep.subr.bf16.mxu0 %v1995_v1  ;;  %v2302_v1 = vld [vmem:[%s2451_s8] sm:$0xff] }
 0x259   : > { %v590_v51 = vpop.f32.mrb[4].mxu1 }
 0x25a   : > { %v591_v52 = vadd.f32 %v590_v51, %v544_v47  ;;  %v1779_v53 = vpop.f32.mrb[5].mxu1  ;;  %v825_v47 = vunpack.c.l.s4 %v2001_v46 }
 0x25b   : > { %v593_v54 = vpop.f32.mrb[6].mxu1 }
 0x25c   : > { %v1780_v55 = vpop.f32.mrb[7].mxu1  ;;  %v826_v50 = vunpack.c.0.s8 %v825_v47 }
 0x25e   : > { %v2289_v54 = vsub.s32 %v826_v50, %v2234_v3 }
 0x261   : > { %v638_v56 = vpop.f32.mrb[8].mxu1 }
 0x262   : > { %v644_v58 = vadd.f32 %v638_v56, %v591_v52  ;;  %v1785_v59 = vpop.f32.mrb[9].mxu1  ;;  %v1894_v52 = vld [vmem:[%s2453_s10 + $0x38] sm:$0xff]  }
 0x263   : > { %v641_v60 = vpop.f32.mrb[10].mxu1  ;;  %1802 = vmatpush3.bf16.msra.mxu0 %v1894_v52 }
 0x264   : > { %v2229_v61 = vadd.f32 %v649_v57, %v644_v58  ;;  %v1786_v62 = vpop.f32.mrb[11].mxu1  ;;  %v2297_v60 = vld [vmem:[%s2451_s8 + $0x8] sm:$0xff] }
 0x266   : > { %v652_v63 = vpack.c.bf16 %v2229_v61, %v2229_v61 }
 0x268   : > { %782 = vmatmul.mubr.bf16.vlgmr.msra.gmra.mrb[12].mxu1 %v652_v63 }
 0x33b   : > { %v783_v0 = vpop.f32.mrb[12].mxu1 }
 0x33c   : > { %v785_v2 = vpop.f32.mrb[13].mxu1  ;;  %v2252_v25 = vadd.f32 %v1711_v24, %v783_v0 }
 0x33d   : > { %810 = vst.msk [vmem:[#allocation4] sm:$0xff] %vm809_vm5, %v785_v2  ;;  %812 = vrot.lane.b32.xlu1 %v785_v2, %s2000_s13  ;;  %v787_v4 = vpop.f32.mrb[14].mxu1 }
 0x33e   : > { %v788_v5 = vpop.f32.mrb[15].mxu1  ;;  %v799_v28 = vand.u32 2147483647, %v2252_v25  ;;  %v798_v53 = vmax.f32 %v2252_v25, 0.0 }
 0x340   : > { %v800_v30 = vsub.f32 0.0, %v799_v28 }
 0x342   : > { %v801_v32 = vmul.f32 1.442695, %v800_v30 }
 0x344   : > { %v820_v7 = vld [vmem:[#allocation4] sm:$0xff]  ;;  %1895 = vpow2.f32 %v801_v32 }
 0x345   : > { %v1030_v8 = vrot.slane %v820_v7, %v2238_v6  ;;  %v1041_v10 = vrot.slane %v820_v7, %v1040_v9  ;;  %v1052_v12 = vrot.slane %v820_v7, %v1051_v11  ;;  %v1063_v14 = vrot.slane %v820_v7, %v1062_v13 }
 0x346   : > { %v1074_v16 = vrot.slane %v820_v7, %v1073_v15  ;;  %v1085_v18 = vrot.slane %v820_v7, %v1084_v17  ;;  %v1096_v20 = vrot.slane %v820_v7, %v1095_v19  ;;  %v1107_v22 = vrot.slane %v820_v7, %v1106_v21 }
 0x347   : > { %1036 = vbcast.lane.b32.xlu1 %v1030_v8, 264  ;;  %1032 = vbcast.lane.b32.xlu0 %v1030_v8, 256 }
 0x34b   : > { %1047 = vbcast.lane.b32.xlu1 %v1041_v10, 264  ;;  %1043 = vbcast.lane.b32.xlu0 %v1041_v10, 256 }
 0x34e   : > { %v1896_v38 = vpop.eup %1895 }
 0x34f   : > { %1058 = vbcast.lane.b32.xlu1 %v1052_v12, 264  ;;  %1054 = vbcast.lane.b32.xlu0 %v1052_v12, 256  ;;  %v803_v40 = vadd.f32 1.0, %v1896_v38 }
 0x351   : > { %1897 = vlog2.f32 %v803_v40 }
 0x353   : > { %1069 = vbcast.lane.b32.xlu1 %v1063_v14, 264  ;;  %1065 = vbcast.lane.b32.xlu0 %v1063_v14, 256 }
 0x357   : > { %1080 = vbcast.lane.b32.xlu1 %v1074_v16, 264  ;;  %1076 = vbcast.lane.b32.xlu0 %v1074_v16, 256 }
 0x35b   : > { %1091 = vbcast.lane.b32.xlu1 %v1085_v18, 264  ;;  %1087 = vbcast.lane.b32.xlu0 %v1085_v18, 256  ;;  %v1898_v48 = vpop.eup %1897 }
 0x35c   : > { %v805_v51 = vmul.f32 0.6931472, %v1898_v48 }
 0x35e   : > { %v806_v55 = vadd.f32 %v805_v51, %v798_v53 }
 0x35f   : > { %1102 = vbcast.lane.b32.xlu1 %v1096_v20, 264  ;;  %1098 = vbcast.lane.b32.xlu0 %v1096_v20, 256 }
 0x360   : > { %v830_v56 = vrot.slane %v806_v55, %v2289_v54  ;;  %v2309_v5 = vmul.f32 %v806_v55, %v2229_v61 }
 0x362   : > { %v846_v57 = vrot.slane %v830_v56, %v2289_v54  ;;  %v838_v58 = vcombine.high %v830_v56, %v830_v56  ;;  %v985_v12 = vrot.slane %v2309_v5, %v2289_v54 }
 0x363   : > { %1113 = vbcast.lane.b32.xlu1 %v1107_v22, 264  ;;  %1109 = vbcast.lane.b32.xlu0 %v1107_v22, 256 }
 0x364   : > { %v875_v59 = vrot.slane %v846_v57, %v2238_v6  ;;  %v860_v62 = vrot.slane %v838_v58, %v2289_v54  ;;  %v1001_v18 = vrot.slane %v985_v12, %v2289_v54  ;;  %v993_v25 = vcombine.high %v985_v12, %v985_v12 }
 0x366   : > { %v913_v63 = vmul.f32 %v875_v59, %v2297_v60  ;;  %v912_v0 = vmul.f32 %v875_v59, %v2302_v1  ;;  %v879_v2 = vrot.slane %v860_v62, %v2238_v6  ;;  %v870_v20 = vcombine.high %v860_v62, %v860_v62 }
 0x367   : > { %v1118_v24 = vrot.slane %v1001_v18, %v2238_v6  ;;  %v1015_v35 = vrot.slane %v993_v25, %v2289_v54 }
 0x368   : > { %v930_v3 = vmul.f32 1.442695, %v913_v63  ;;  %v928_v4 = vmul.f32 1.442695, %v912_v0  ;;  %v915_v10 = vmul.f32 %v879_v2, %v2297_v60  ;;  %v887_v28 = vrot.slane %v870_v20, %v2238_v6 }
 0x369   : > { %v1122_v46 = vrot.slane %v1015_v35, %v2238_v6 }
 0x36a   : > { %1899 = vpow2.f32 %v930_v3  ;;  %v934_v14 = vmul.f32 1.442695, %v915_v10  ;;  %v918_v44 = vmul.f32 %v887_v28, %v2302_v1 }
 0x36b   : > { %1901 = vpow2.f32 %v928_v4 }
 0x36c   : > { %1903 = vpow2.f32 %v934_v14  ;;  %v940_v56 = vmul.f32 1.442695, %v918_v44 }
 0x3af   : > { %v813_v23 = vpop.permute.xlu1 %812 }
 0x3b0   : > { %815 = vst.msk [vmem:[#allocation5] sm:$0xff] %vm809_vm5, %v813_v23  ;;  %v1900_v23 = vpop.eup %1899 }
 0x3b7   : > { %v821_v26 = vld [vmem:[#allocation5] sm:$0xff] }
 0x3b8   : > { %v1307_v27 = vrot.slane %v821_v26, %v2238_v6  ;;  %v1318_v29 = vrot.slane %v821_v26, %v1040_v9  ;;  %v1329_v31 = vrot.slane %v821_v26, %v1051_v11  ;;  %v1340_v33 = vrot.slane %v821_v26, %v1062_v13 }
 0x3b9   : > { %v1351_v34 = vrot.slane %v821_v26, %v1073_v15  ;;  %v1362_v36 = vrot.slane %v821_v26, %v1084_v17  ;;  %v1373_v39 = vrot.slane %v821_v26, %v1095_v19  ;;  %v1384_v42 = vrot.slane %v821_v26, %v1106_v21  ;;  %v1037_v7 = vpop.permute.xlu1 %1036  ;;  %v1033_v8 = vpop.permute.xlu0 %1032 }
 0x3ba   : > { %1313 = vbcast.lane.b32.xlu1 %v1307_v27, 264  ;;  %1309 = vbcast.lane.b32.xlu0 %v1307_v27, 256  ;;  %v868_v9 = vcombine.high %v846_v57, %v846_v57  ;;  %v914_v11 = vmul.f32 %v879_v2, %v2302_v1  ;;  %v823_v19 = vcombine.high %v806_v55, %v806_v55  ;;  %v1902_v26 = vpop.eup %1901 }
 0x3bb   : > { %v1155_v32 = vmul.f32 %v1118_v24, %v1033_v8  ;;  %v1189_v37 = vmul.f32 0.0, %v1902_v26  ;;  %v1904_v45 = vpop.eup %1903  ;;  %v1023_v57 = vcombine.high %v1001_v18, %v1001_v18  ;;  %v1025_v18 = vcombine.high %v1015_v35, %v1015_v35 }
 0x3bc   : > { %v883_v13 = vrot.slane %v868_v9, %v2238_v6  ;;  %v932_v17 = vmul.f32 1.442695, %v914_v11  ;;  %v837_v27 = vrot.slane %v823_v19, %v2289_v54  ;;  %v978_v19 = vcombine.high %v2309_v5, %v2309_v5 }
 0x3bd   : > { %v1048_v15 = vpop.permute.xlu1 %1047  ;;  %v1044_v16 = vpop.permute.xlu0 %1043  ;;  %v2327_v41 = vadd.f32 %v1189_v37, %v1155_v32  ;;  %v1130_v26 = vrot.slane %v1025_v18, %v2238_v6 }
 0x3be   : > { %1324 = vbcast.lane.b32.xlu1 %v1318_v29, 264  ;;  %1320 = vbcast.lane.b32.xlu0 %v1318_v29, 256  ;;  %v917_v21 = vmul.f32 %v883_v13, %v2297_v60  ;;  %1905 = vpow2.f32 %v932_v17  ;;  %v916_v22 = vmul.f32 %v883_v13, %v2302_v1  ;;  %v853_v38 = vrot.slane %v837_v27, %v2289_v54 }
 0x3bf   : > { %v839_v48 = vcombine.high %v837_v27, %v837_v27  ;;  %v1158_v51 = vmul.f32 %v1122_v46, %v1048_v15  ;;  %v1157_v52 = vmul.f32 %v1122_v46, %v1044_v16  ;;  %v992_v27 = vrot.slane %v978_v19, %v2289_v54 }
 0x3c0   : > { %v891_v49 = vrot.slane %v853_v38, %v2238_v6  ;;  %v869_v20 = vcombine.high %v853_v38, %v853_v38 }
 0x3c1   : > { %v1059_v29 = vpop.permute.xlu1 %1058  ;;  %v1055_v30 = vpop.permute.xlu0 %1054  ;;  %v867_v58 = vrot.slane %v839_v48, %v2289_v54  ;;  %v1008_v37 = vrot.slane %v992_v27, %v2289_v54  ;;  %v994_v46 = vcombine.high %v992_v27, %v992_v27 }
 0x3c2   : > { %1335 = vbcast.lane.b32.xlu1 %v1329_v31, 264  ;;  %1331 = vbcast.lane.b32.xlu0 %v1329_v31, 256  ;;  %v1156_v31 = vmul.f32 %v1118_v24, %v1037_v7  ;;  %v921_v63 = vmul.f32 %v891_v49, %v2297_v60  ;;  %v920_v3 = vmul.f32 %v891_v49, %v2302_v1 }
 0x3c3   : > { %v1126_v7 = vrot.slane %v1023_v57, %v2238_v6  ;;  %v895_v9 = vrot.slane %v867_v58, %v2238_v6  ;;  %v871_v38 = vcombine.high %v867_v58, %v867_v58  ;;  %v1134_v49 = vrot.slane %v1008_v37, %v2238_v6 }
 0x3c4   : > { %v946_v10 = vmul.f32 1.442695, %v921_v63  ;;  %v944_v17 = vmul.f32 1.442695, %v920_v3  ;;  %v2372_v58 = vrot.slane %v994_v46, %v2289_v54 }
 0x3c5   : > { %v1066_v43 = vpop.permute.xlu0 %1065  ;;  %v1160_v11 = vmul.f32 %v1126_v7, %v1059_v29  ;;  %v1159_v12 = vmul.f32 %v1126_v7, %v1055_v30  ;;  %v922_v24 = vmul.f32 %v895_v9, %v2302_v1  ;;  %v899_v29 = vrot.slane %v869_v20, %v2238_v6 }
 0x3c6   : > { %1346 = vbcast.lane.b32.xlu1 %v1340_v33, 264  ;;  %1342 = vbcast.lane.b32.xlu0 %v1340_v33, 256  ;;  %v938_v33 = vmul.f32 1.442695, %v917_v21  ;;  %v923_v21 = vmul.f32 %v895_v9, %v2297_v60  ;;  %v1026_v46 = vcombine.high %v2372_v58, %v2372_v58 }
 0x3c8   : > { %1907 = vpow2.f32 %v938_v33  ;;  %v1906_v47 = vpop.eup %1905  ;;  %v1161_v33 = vmul.f32 %v1130_v26, %v1066_v43 }
 0x3c9   : > { %v1200_v55 = vmul.f32 %v1906_v47, %v2327_v41  ;;  %v1077_v62 = vpop.permute.xlu0 %1076 }
 0x3ca   : > { %1357 = vbcast.lane.b32.xlu1 %v1351_v34, 264  ;;  %1353 = vbcast.lane.b32.xlu0 %v1351_v34, 256  ;;  %v936_v34 = vmul.f32 1.442695, %v916_v22 }
 0x3cb   : > { %v2338_v2 = vadd.f32 %v1200_v55, %v1157_v52  ;;  %v903_v52 = vrot.slane %v871_v38, %v2238_v6  ;;  %v1163_v55 = vmul.f32 %v1134_v49, %v1077_v62 }
 0x3cc   : > { %1909 = vpow2.f32 %v936_v34 }
 0x3cd   : > { %v1088_v16 = vpop.permute.xlu0 %1087  ;;  %v927_v7 = vmul.f32 %v903_v52, %v2297_v60 }
 0x3ce   : > { %1368 = vbcast.lane.b32.xlu1 %v1362_v36, 264  ;;  %1364 = vbcast.lane.b32.xlu0 %v1362_v36, 256  ;;  %v1190_v36 = vmul.f32 0.0, %v1900_v23 }
 0x3d0   : > { %v2325_v40 = vadd.f32 %v1190_v36, %v1156_v31  ;;  %v950_v31 = vmul.f32 1.442695, %v923_v21  ;;  %v948_v36 = vmul.f32 1.442695, %v922_v24  ;;  %v1024_v21 = vcombine.high %v1008_v37, %v1008_v37 }
 0x3d1   : > { %v2358_v30 = vpop.permute.xlu0 %1098 }
 0x3d2   : > { %1379 = vbcast.lane.b32.xlu1 %v1373_v39, 264  ;;  %1375 = vbcast.lane.b32.xlu0 %v1373_v39, 256  ;;  %v919_v39 = vmul.f32 %v887_v28, %v2297_v60  ;;  %v1201_v53 = vmul.f32 %v1904_v45, %v2325_v40  ;;  %v1908_v4 = vpop.eup %1907 }
 0x3d4   : > { %v942_v50 = vmul.f32 1.442695, %v919_v39  ;;  %v2336_v0 = vadd.f32 %v1201_v53, %v1158_v51  ;;  %v925_v39 = vmul.f32 %v899_v29, %v2297_v60 }
 0x3d5   : > { %v2366_v48 = vpop.permute.xlu0 %1109 }
 0x3d6   : > { %1390 = vbcast.lane.b32.xlu1 %v1384_v42, 264  ;;  %1386 = vbcast.lane.b32.xlu0 %v1384_v42, 256  ;;  %v1070_v42 = vpop.permute.xlu1 %1069  ;;  %1911 = vpow2.f32 %v942_v50  ;;  %v1910_v8 = vpop.eup %1909  ;;  %v1214_v13 = vmul.f32 %v1908_v4, %v2336_v0  ;;  %v954_v51 = vmul.f32 1.442695, %v925_v39 }
 0x3d7   : > { %1913 = vpow2.f32 %v940_v56  ;;  %v1213_v14 = vmul.f32 %v1910_v8, %v2338_v2  ;;  %v1162_v32 = vmul.f32 %v1130_v26, %v1070_v42  ;;  %v924_v42 = vmul.f32 %v899_v29, %v2302_v1 }
 0x3d8   : > { %v2348_v22 = vadd.f32 %v1214_v13, %v1160_v11  ;;  %1915 = vpow2.f32 %v946_v10  ;;  %v1138_v10 = vrot.slane %v2372_v58, %v2238_v6 }
 0x3d9   : > { %v2350_v23 = vadd.f32 %v1213_v14, %v1159_v12  ;;  %1917 = vpow2.f32 %v944_v17  ;;  %v952_v4 = vmul.f32 1.442695, %v924_v42  ;;  %v958_v17 = vmul.f32 1.442695, %v927_v7 }
 0x3da   : > { %v1081_v59 = vpop.permute.xlu1 %1080  ;;  %1919 = vpow2.f32 %v950_v31  ;;  %v1165_v14 = vmul.f32 %v1138_v10, %v1088_v16 }
 0x3db   : > { %1921 = vpow2.f32 %v948_v36  ;;  %v1164_v53 = vmul.f32 %v1134_v49, %v1081_v59  ;;  %v926_v59 = vmul.f32 %v903_v52, %v2302_v1 }
 0x3dc   : > { %1923 = vpow2.f32 %v954_v51 }
 0x3dd   : > { %1925 = vpow2.f32 %v952_v4 }
 0x3de   : > { %v1092_v15 = vpop.permute.xlu1 %1091  ;;  %1927 = vpow2.f32 %v958_v17 }
 0x3df   : > { %v1166_v54 = vmul.f32 %v1138_v10, %v1092_v15 }
 0x3e0   : > { %v1912_v25 = vpop.eup %1911 }
 0x3e1   : > { %v1914_v28 = vpop.eup %1913  ;;  %v1227_v34 = vmul.f32 %v1912_v25, %v2348_v22 }
 0x3e2   : > { %v2356_v5 = vpop.permute.xlu1 %1102  ;;  %v1226_v35 = vmul.f32 %v1914_v28, %v2350_v23  ;;  %v1916_v43 = vpop.eup %1915  ;;  %v956_v28 = vmul.f32 1.442695, %v926_v59 }
 0x3e3   : > { %v1232_v44 = vadd.f32 %v1227_v34, %v1162_v32  ;;  %v1918_v50 = vpop.eup %1917 }
 0x3e4   : > { %v1231_v45 = vadd.f32 %v1226_v35, %v1161_v33  ;;  %v1920_v62 = vpop.eup %1919  ;;  %1929 = vpow2.f32 %v956_v28 }
 0x3e5   : > { %v1240_v56 = vmul.f32 %v1916_v43, %v1232_v44  ;;  %v1922_v13 = vpop.eup %1921 }
 0x3e6   : > { %v2364_v47 = vpop.permute.xlu1 %1113  ;;  %v1239_v57 = vmul.f32 %v1918_v50, %v1231_v45 }
 0x3e7   : > { %v1245_v8 = vadd.f32 %v1240_v56, %v1164_v53 }
 0x3e8   : > { %v1244_v9 = vadd.f32 %v1239_v57, %v1163_v55 }
 0x3e9   : > { %v1253_v19 = vmul.f32 %v1920_v62, %v1245_v8 }
 0x3ea   : > { %v1252_v20 = vmul.f32 %v1922_v13, %v1244_v9 }
 0x3eb   : > { %v1258_v29 = vadd.f32 %v1253_v19, %v1166_v54 }
 0x3ec   : > { %v1257_v31 = vadd.f32 %v1252_v20, %v1165_v14 }
 0x42c   : > { %v1314_v63 = vpop.permute.xlu1 %1313  ;;  %v1310_v3 = vpop.permute.xlu0 %1309 }
 0x42d   : > { %v1393_v24 = vmul.f32 %v1314_v63, %v2325_v40  ;;  %v1392_v25 = vmul.f32 %v1310_v3, %v2327_v41  ;;  %v1924_v40 = vpop.eup %1923 }
 0x42e   : > { %v1926_v35 = vpop.eup %1925  ;;  %v1266_v38 = vmul.f32 %v1924_v40, %v1258_v29 }
 0x42f   : > { %v1265_v39 = vmul.f32 %v1926_v35, %v1257_v31  ;;  %v1928_v7 = vpop.eup %1927 }
 0x430   : > { %v1325_v11 = vpop.permute.xlu1 %1324  ;;  %v1321_v12 = vpop.permute.xlu0 %1320 }
 0x431   : > { %v1395_v18 = vmul.f32 %v1325_v11, %v2336_v0  ;;  %v1394_v60 = vmul.f32 %v1321_v12, %v2338_v2  ;;  %v1142_v0 = vrot.slane %v1024_v21, %v2238_v6  ;;  %v1408_v2 = vadd.f32 %v1393_v24, %v1392_v25  ;;  %v1930_v12 = vpop.eup %1929 }
 0x433   : > { %v1415_v16 = vadd.f32 %v1395_v18, %v1394_v60  ;;  %v1168_v36 = vmul.f32 %v1142_v0, %v2356_v5  ;;  %v1409_v42 = vrot.slane %v1408_v2, 4 }
 0x434   : > { %v1336_v26 = vpop.permute.xlu1 %1335  ;;  %v1332_v27 = vpop.permute.xlu0 %1331 }
 0x435   : > { %v1397_v1 = vmul.f32 %v1336_v26, %v2348_v22  ;;  %v1396_v15 = vmul.f32 %v1332_v27, %v2350_v23  ;;  %v1167_v22 = vmul.f32 %v1142_v0, %v2358_v30  ;;  %v1416_v23 = vrot.slane %v1415_v16, 4 }
 0x436   : > { %v1271_v5 = vadd.f32 %v1266_v38, %v1168_v36  ;;  %v1146_v30 = vrot.slane %v1026_v46, %v2238_v6  ;;  %v1410_v57 = vadd.f32 %v1409_v42, %v1408_v2 }
 0x437   : > { %v1422_v32 = vadd.f32 %v1397_v1, %v1396_v15  ;;  %v1417_v55 = vadd.f32 %v1416_v23, %v1415_v16 }
 0x438   : > { %v1347_v33 = vpop.permute.xlu1 %1346  ;;  %v1343_v34 = vpop.permute.xlu0 %1342  ;;  %v1170_v59 = vmul.f32 %v1146_v30, %v2364_v47  ;;  %v1279_v54 = vmul.f32 %v1928_v7, %v1271_v5  ;;  %v1411_v17 = vrot.slane %v1410_v57, 2 }
 0x439   : > { %v1399_v41 = vmul.f32 %v1347_v33, %v1232_v44  ;;  %v1398_v37 = vmul.f32 %v1343_v34, %v1231_v45  ;;  %v1423_v43 = vrot.slane %v1422_v32, 4  ;;  %v1270_v45 = vadd.f32 %v1265_v39, %v1167_v22 }
 0x43a   : > { %v1418_v62 = vrot.slane %v1417_v55, 2  ;;  %v1284_v47 = vadd.f32 %v1279_v54, %v1170_v59 }
 0x43b   : > { %v1429_v49 = vadd.f32 %v1399_v41, %v1398_v37  ;;  %v1424_v63 = vadd.f32 %v1423_v43, %v1422_v32  ;;  %v1278_v14 = vmul.f32 %v1930_v12, %v1270_v45 }
 0x43c   : > { %v1358_v50 = vpop.permute.xlu1 %1357  ;;  %v1354_v51 = vpop.permute.xlu0 %1353  ;;  %v1419_v27 = vadd.f32 %v1418_v62, %v1417_v55 }
 0x43d   : > { %v1401_v52 = vmul.f32 %v1358_v50, %v1245_v8  ;;  %v1400_v53 = vmul.f32 %v1354_v51, %v1244_v9  ;;  %v1430_v44 = vrot.slane %v1429_v49, 4  ;;  %v1169_v8 = vmul.f32 %v1146_v30, %v2366_v48 }
 0x43e   : > { %v1425_v6 = vrot.slane %v1424_v63, 2  ;;  %v1412_v48 = vadd.f32 %v1411_v17, %v1410_v57  ;;  %v1420_v41 = vrot.slane %v1419_v27, 1 }
 0x43f   : > { %v1436_v56 = vadd.f32 %v1401_v52, %v1400_v53  ;;  %v1431_v58 = vadd.f32 %v1430_v44, %v1429_v49  ;;  %v1283_v1 = vadd.f32 %v1278_v14, %v1169_v8 }
 0x440   : > { %v1369_v3 = vpop.permute.xlu1 %1368  ;;  %v1365_v4 = vpop.permute.xlu0 %1364  ;;  %v1426_v15 = vadd.f32 %v1425_v6, %v1424_v63  ;;  %v1413_v23 = vrot.slane %v1412_v48, 1  ;;  %v1421_v43 = vadd.f32 %v1420_v41, %v1419_v27 }
 0x441   : > { %v1437_v10 = vrot.slane %v1436_v56, 4  ;;  %v1403_v11 = vmul.f32 %v1369_v3, %v1258_v29  ;;  %v1402_v9 = vmul.f32 %v1365_v4, %v1257_v31  ;;  %v1432_v20 = vrot.slane %v1431_v58, 2  ;;  %v1712_v4 = vld [vmem:[%s2452_s9] ss:$0 sm:$0xff] }
 0x442   : > { %v1427_v37 = vrot.slane %v1426_v15, 1  ;;  %v1414_v53 = vadd.f32 %v1413_v23, %v1412_v48  ;;  %v1497_v59 = vmul.f32 %v1712_v4, %v2229_v61 }
 0x443   : > { %v1438_v13 = vadd.f32 %v1437_v10, %v1436_v56  ;;  %v1443_v18 = vadd.f32 %v1403_v11, %v1402_v9  ;;  %v1433_v0 = vadd.f32 %v1432_v20, %v1431_v58 }
 0x444   : > { %v1380_v60 = vpop.permute.xlu1 %1379  ;;  %v1376_v19 = vpop.permute.xlu0 %1375  ;;  %v1428_v52 = vadd.f32 %v1427_v37, %v1426_v15 }
 0x445   : > { %v1405_v21 = vmul.f32 %v1380_v60, %v1271_v5  ;;  %v1404_v24 = vmul.f32 %v1376_v19, %v1270_v45  ;;  %v1439_v25 = vrot.slane %v1438_v13, 2  ;;  %v1444_v26 = vrot.slane %v1443_v18, 4 }
 0x446   : > { %v1434_v38 = vrot.slane %v1433_v0, 1  ;;  %v1473_v45 = vsel %vm1472_vm6, %v1421_v43, %v1414_v53 }
 0x447   : > { %v1450_v28 = vadd.f32 %v1405_v21, %v1404_v24  ;;  %v1445_v16 = vadd.f32 %v1444_v26, %v1443_v18  ;;  %v1440_v34 = vadd.f32 %v1439_v25, %v1438_v13  ;;  %v1475_v63 = vsel %vm1474_vm7, %v1428_v52, %v1473_v45 }
 0x448   : > { %v1391_v29 = vpop.permute.xlu1 %1390  ;;  %v1387_v31 = vpop.permute.xlu0 %1386  ;;  %v1435_v44 = vadd.f32 %v1434_v38, %v1433_v0 }
 0x449   : > { %v1451_v2 = vrot.slane %v1450_v28, 4  ;;  %v1407_v32 = vmul.f32 %v1391_v29, %v1284_v47  ;;  %v1406_v33 = vmul.f32 %v1387_v31, %v1283_v1  ;;  %v1446_v40 = vrot.slane %v1445_v16, 2 }
 0x44a   : > { %v1441_v42 = vrot.slane %v1440_v34, 1  ;;  %v1477_v7 = vsel %vm1476_vm8, %v1435_v44, %v1475_v63 }
 0x44b   : > { %v1452_v35 = vadd.f32 %v1451_v2, %v1450_v28  ;;  %v1457_v36 = vadd.f32 %v1407_v32, %v1406_v33  ;;  %v1447_v22 = vadd.f32 %v1446_v40, %v1445_v16 }
 0x44c   : > { %v1442_v5 = vadd.f32 %v1441_v42, %v1440_v34 }
 0x44d   : > { %v1453_v39 = vrot.slane %v1452_v35, 2  ;;  %v1458_v46 = vrot.slane %v1457_v36, 4  ;;  %v1448_v49 = vrot.slane %v1447_v22, 1 }
 0x44e   : > { %v1479_v10 = vsel %vm1478_vm9, %v1442_v5, %v1477_v7 }
 0x44f   : > { %v1454_v50 = vadd.f32 %v1453_v39, %v1452_v35  ;;  %v1459_v51 = vadd.f32 %v1458_v46, %v1457_v36  ;;  %v1449_v30 = vadd.f32 %v1448_v49, %v1447_v22 }
 0x451   : > { %v1455_v55 = vrot.slane %v1454_v50, 1  ;;  %v1460_v56 = vrot.slane %v1459_v51, 2  ;;  %v1481_v11 = vsel %vm1480_vm10, %v1449_v30, %v1479_v10 }
 0x453   : > { %v1461_v57 = vadd.f32 %v1460_v56, %v1459_v51  ;;  %v1456_v3 = vadd.f32 %v1455_v55, %v1454_v50 }
 0x455   : > { %v1462_v58 = vrot.slane %v1461_v57, 1  ;;  %v1483_v8 = vsel %vm1482_vm11, %v1456_v3, %v1481_v11 }
 0x457   : > { %v1463_v12 = vadd.f32 %v1462_v58, %v1461_v57 }
 0x459   : > { %v1485_v9 = vsel %vm1484_vm12, %v1463_v12, %v1483_v8 }
 0x45a   : > { %v1498_v62 = vadd.f32 %v1497_v59, %v1485_v9 }
 0x45c   : > { %v1499_v13 = vpack.c.bf16 %v1498_v62, %v1498_v62 }
 0x45e   : > { %1804 = vmatmul.mubr.bf16.vlgmr.msra.gmra.mrb[4].mxu0 %v1499_v13 }
 0x531   : > { %v1598_v61 = vpop.f32.mrb[4].mxu0 }
 0x532   : > { %1604 = vst [vmem:[%s377_s29] sm:$0xff] %v1598_v61  ;;  %v1805_v54 = vpop.f32.mrb[5].mxu0 }
 0x533   : > { %v1601_v14 = vpop.f32.mrb[6].mxu0 }
 0x534   : > { %1944 = shalt.err (!%p1941_p3)
}
 0x535   : > { %s1945_s24 = scalar_lea.hbm %s2403_s15, 128  ;;  %s1949_s13 = scalar_lea.hbm %s2454_s11, 256 }
 0x536   : > { %p1946_p4 = scmp.ne.s32.totalorder %s2403_s15, %s1945_s24  ;;  %p1950_p9 = scmp.lt.u32.totalorder %s2403_s15, %s2454_s11 }
 0x537   : > { %p1951_p10 = scmp.lt.u32.totalorder %s1949_s13, %s1945_s24  ;;  %p1953_p12 = scmp.lt.u32.totalorder %s1945_s24, %s2403_s15 }
 0x538   : > { %p1947_p7 = pnand %p1946_p4, %p2101_p5 }
 0x539   : > { %p1952_p11 = por %p1951_p10, %p1950_p9 }
 0x53a   : > { %p1948_p8 = pneg %p1947_p7 }
 0x53b   : > { %p1954_p13 = por %p1953_p12, %p1952_p11 }
 0x53d   : > { %p1955_p0 = pnand %p1954_p13, %p1948_p8 }
 0x53f   : > { %1958 = shalt.err (!%p1955_p0)
}
 0x540   : > { %1807 = dma.vmem_to_hbm [thread:$0]  (%p2101_p5), %s2398_s30, 128, %s2403_s15, %s1606_s16   ;;  %v1806_v17 = vpop.f32.mrb[7].mxu0 }
 0x541 PF: > { %p1813_p1 = scmp.ge.s32.totalorder %s1993_s20, 2  ;;  %s1631_s0 = sand.u32 1, %s1981_s17  }
 0x542   : > { %s1632_s22 = scalar_lea.sflag [#allocation11], %s1631_s0 }
 0x543   : > { %p1810_p2 = pnand %p1813_p1, %p2105_p6 }
 0x545   : > { %1976 = dma.done.wait (!%p1810_p2), %s1632_s22, 128  }
 0x546   : > { %1978 = vsyncadd (!%p1810_p2), %s1632_s22, 4294967168  ;;  %p21_p3 = scmp.ge.s32.totalorder %s2088_s23, 4   ;;  %s2459_s17 = smov %s1985_s18 }
 0x547   : > { %s2460_s18 = smov %s1989_s19  ;;  %s2461_s19 = smov %s2099_s26 }
 0x548   : > { %s2462_s20 = smov %s2088_s23  ;;  %23 = sbr.rel (!%p21_p3) target bundleno = 5 (0x5), region = 120 }
 0x54f   :  { %1637 = vsyncpa [#allocation11], 1 }
 0x550   :  { %1639 = vsyncpa [#allocation11 + $0x1], 1 }

</bundles_post_ra>
